<compile_context>
chip_gen: v7x
topology: tpu7x:2x2x1
jax: 0.10.0
libtpu: 0.0.40
codegen_flags: <defaults>
</compile_context>

<pallas_src>
import functools

import jax
import jax.numpy as jnp
from jax.experimental import pallas as pl
from jax.experimental.pallas import tpu as pltpu

EPS = 1e-5                  # PyTorch BatchNorm1d default eps
LANE = 128                  # TPU lane width
MXU_DTYPE = jnp.bfloat16    # matmul-operand dtype (accumulation stays f32)


def _round_up(x, m):
  return ((x + m - 1) // m) * m


# ----------------------------------------------------------------------------
# Pallas kernels
# ----------------------------------------------------------------------------
def _edge_mlp_kernel(h1_ref, w2_ref, b2_ref, w3_ref, b3_ref, out_ref):
  """Per node tile: layer-2 Linear->ReLU on TM*k layer-1-activated edge
  features, mean over the k contiguous messages of each node, final Linear.

  Layer 1 is folded into the glue at node level (see forward()), so only the
  two K=128 GEMMs hit the MXU.  The final Linear has no activation, so it
  commutes with the mean (mean_j(W h_j + b) == W mean_j(h_j) + b): applying it
  after aggregation is mathematically identical to the per-edge Linear and
  avoids a k-times-larger matmul.
  """
  tm, hidden = out_ref.shape
  k = h1_ref.shape[0] // tm

  h = jnp.dot(h1_ref[...], w2_ref[...],
              preferred_element_type=jnp.float32) + b2_ref[...]
  h = jnp.maximum(h, 0.0)
  # mean over the k neighbors; k is a multiple of the sublane pack so the
  # reshape is tile-aligned (no relayout copy).
  h = jnp.sum(h.reshape(tm, k, hidden), axis=1) * (1.0 / k)
  out_ref[...] = jnp.dot(h.astype(MXU_DTYPE), w3_ref[...],
                         preferred_element_type=jnp.float32) + b3_ref[...]


def _out_mlp_kernel(u_ref, w1_ref, b1_ref, w2_ref, b2_ref, w3_ref, b3_ref,
                    out_ref):
  """outnn: Linear->ReLU, Linear->ReLU, Linear.
  Rows padded to 8, contraction dim padded to 256, last layer lane-padded."""
  h = jnp.dot(u_ref[...], w1_ref[...],
              preferred_element_type=jnp.float32) + b1_ref[...]
  h = jnp.maximum(h, 0.0)
  h = jnp.dot(h.astype(MXU_DTYPE), w2_ref[...],
              preferred_element_type=jnp.float32) + b2_ref[...]
  h = jnp.maximum(h, 0.0)
  out_ref[...] = jnp.dot(h.astype(MXU_DTYPE), w3_ref[...],
                         preferred_element_type=jnp.float32) + b3_ref[...]


# ----------------------------------------------------------------------------
# Pallas wrappers
# ----------------------------------------------------------------------------
def edge_conv_pallas(h1, layers, *, n_nodes_pad, k, tm):
  """h1: (n_nodes_pad*k, H) bf16 layer-1 activations (k messages of node i are
  contiguous in rows [i*k,(i+1)*k)); layers: [(w,b)]*2, w bf16, b f32 (1,H)."""
  (w2, b2), (w3, b3) = layers
  hidden = w3.shape[1]
  grid = (n_nodes_pad // tm,)
  # Weights/biases use a constant index map: Pallas only issues a new DMA when
  # the block index changes, so they are fetched once.  (The duplicated ~66 KiB
  # double-buffer allocation is accepted; pl.Buffered(1) deliberately avoided
  # to keep lowering portable.)
  const = lambda i: (0, 0)
  return pl.pallas_call(
      _edge_mlp_kernel,
      out_shape=jax.ShapeDtypeStruct((n_nodes_pad, hidden), jnp.float32),
      grid=grid,
      in_specs=[
          pl.BlockSpec((tm * k, h1.shape[1]), lambda i: (i, 0)),
          pl.BlockSpec(w2.shape, const), pl.BlockSpec(b2.shape, const),
          pl.BlockSpec(w3.shape, const), pl.BlockSpec(b3.shape, const),
      ],
      out_specs=pl.BlockSpec((tm, hidden), lambda i: (i, 0)),
      compiler_params=pltpu.CompilerParams(
          # node tiles are independent -> both v7x TensorCores can split them;
          # 32 MiB overrides v5e's 16 MiB scoped default and stays well under
          # the v7x 48-56 MiB guidance.
          dimension_semantics=("parallel",),
          vmem_limit_bytes=32 * 1024 * 1024),
  )(h1, w2, b2, w3, b3)


def out_mlp_pallas(feat, layers):
  """feat: (8, 256) bf16 (rows/contraction zero-padded); single step, whole
  arrays resident in VMEM (G is tiny)."""
  (w1, b1), (w2, b2), (w3, b3) = layers
  g = feat.shape[0]
  vmem = pl.BlockSpec(memory_space=pltpu.MemorySpace.VMEM)
  return pl.pallas_call(
      _out_mlp_kernel,
      out_shape=jax.ShapeDtypeStruct((g, w3.shape[1]), jnp.float32),
      in_specs=[vmem] * 7,
      out_specs=vmem,
      compiler_params=pltpu.CompilerParams(vmem_limit_bytes=32 * 1024 * 1024),
  )(feat, w1, b1, w2, b2, w3, b3)


# ----------------------------------------------------------------------------
# Plain-JAX glue (kNN graph, gather, tiny BatchNorms, per-graph mean)
# ----------------------------------------------------------------------------
def batchnorm_train(x, gamma, beta):
  # Train-mode BatchNorm1d, two-pass biased variance (matches PyTorch closer
  # than E[x^2]-mean^2 for large-mean inputs).
  mean = jnp.mean(x, axis=0, keepdims=True)
  var = jnp.mean((x - mean) ** 2, axis=0, keepdims=True)
  return (x - mean) * jax.lax.rsqrt(var + EPS) * gamma + beta


def knn_indices(x, batch, k):
  """k nearest neighbors (self included) within the same graph.
  NOTE: assumes every graph has >= k nodes (same assumption as DynamicEdgeConv)."""
  sq = jnp.sum(x * x, axis=1)
  xxt = jnp.dot(x, x.T, precision=jax.lax.Precision.HIGHEST)
  d = sq[:, None] + sq[None, :] - 2.0 * xxt
  d = jnp.where(batch[:, None] != batch[None, :], jnp.inf, d)
  _, idx = jax.lax.top_k(-d, k)            # (N, k)
  return idx


def segment_mean(x, seg, num_segments):
  sums = jax.ops.segment_sum(x, seg, num_segments=num_segments)
  cnt = jax.ops.segment_sum(jnp.ones((x.shape[0],), x.dtype), seg,
                            num_segments=num_segments)
  return sums / jnp.maximum(cnt, 1.0)[:, None]


# ----------------------------------------------------------------------------
# Deterministic parameter construction (matches the module's layer shapes)
# ----------------------------------------------------------------------------
def _linear(key, fan_in, fan_out):
  kw, kb = jax.random.split(key)
  bound = 1.0 / jnp.sqrt(jnp.float32(fan_in))
  w = jax.random.uniform(kw, (fan_in, fan_out), jnp.float32, -bound, bound)
  b = jax.random.uniform(kb, (fan_out,), jnp.float32, -bound, bound)
  return w, b


def init_params(key, input_dim=3, big_dim=128, bigger_dim=256, global_dim=2,
                output_dim=1):
  k1, k2, k3, k4, k5, k6 = jax.random.split(key, 6)

  def pack(w, b, pad_out_to=None, pad_in_to=None):
    if pad_in_to is not None and w.shape[0] < pad_in_to:      # zero-pad rows
      w = jnp.pad(w, ((0, pad_in_to - w.shape[0]), (0, 0)))
    if pad_out_to is not None and w.shape[1] < pad_out_to:    # lane-pad cols
      w = jnp.pad(w, ((0, 0), (0, pad_out_to - w.shape[1])))
      b = jnp.pad(b, (0, pad_out_to - b.shape[0]))
    return w.astype(MXU_DTYPE), b.reshape(1, -1).astype(jnp.float32)

  w1, b1 = _linear(k1, 2 * input_dim, big_dim)
  feat_in_pad = _round_up(big_dim + global_dim, LANE)          # 130 -> 256
  return {
      "bn_gamma": jnp.ones((1, input_dim), jnp.float32),
      "bn_beta": jnp.zeros((1, input_dim), jnp.float32),
      "bng_gamma": jnp.ones((1, global_dim), jnp.float32),
      "bng_beta": jnp.zeros((1, global_dim), jnp.float32),
      # conv layer 1 stays f32: folded into two node-level matmuls in the glue.
      "conv_w1": w1, "conv_b1": b1,
      "conv": [pack(*_linear(k2, big_dim, big_dim)),
               pack(*_linear(k3, big_dim, big_dim))],
      # outnn: contraction dim 130 zero-padded to 256; final Linear lane-padded.
      "out": [pack(*_linear(k4, big_dim + global_dim, bigger_dim),
                   pad_in_to=feat_in_pad),
              pack(*_linear(k5, bigger_dim, bigger_dim)),
              pack(*_linear(k6, bigger_dim, output_dim), pad_out_to=LANE)],
  }


# ----------------------------------------------------------------------------
# Full forward pass
# ----------------------------------------------------------------------------
def _choose_tm(n):
  """Node-tile rows per grid step.  Small N -> single step; large N -> 256-node
  tiles (4096 message rows) so the post-aggregation GEMM has M>=256 and DMA
  tiles sit near the HBM roofline.  Override via forward(..., tm=...) for
  per-generation tuning (v5e: 128 is enough; v7x: keep n_pad/tm even)."""
  if n <= 512:
    return _round_up(n, 8)
  return 256


@functools.partial(jax.jit, static_argnames=("k", "num_graphs", "out_dim", "tm"))
def forward(x, batch, u, params, *, k=16, num_graphs=2, out_dim=1, tm=None):
  n, f = x.shape
  hidden = params["conv_w1"].shape[1]
  tm = _choose_tm(n) if tm is None else tm
  n_pad = _round_up(n, tm)

  # 1) node BatchNorm (train mode) -- tiny (N, F), glue
  xn = batchnorm_train(x, params["bn_gamma"], params["bn_beta"])

  # 2) DynamicEdgeConv.  kNN graph (glue), then layer 1 folded to node level:
  #      relu(cat([x_i, x_j-x_i]) @ W1 + b1)
  #        == relu(x_i @ (W1a - W1b) + x_j @ W1b + b1)
  #    -> two (N,F)@(F,H) matmuls + a row gather; no K=6 MXU pass over edges.
  idx = knn_indices(xn, batch, k)                              # (N, k)
  w1a, w1b = params["conv_w1"][:f], params["conv_w1"][f:]
  a = xn @ (w1a - w1b)                                         # (N, H)
  b = xn @ w1b                                                 # (N, H)
  h1 = jax.nn.relu(a[:, None, :] + b[idx] + params["conv_b1"]) # (N, k, H)
  h1 = h1.reshape(n * k, hidden).astype(MXU_DTYPE)
  if n_pad != n:                                               # pad to whole node tiles
    h1 = jnp.pad(h1, ((0, (n_pad - n) * k), (0, 0)))
  # fused layer-2 Linear/ReLU, mean over k, layer-3 Linear (Pallas, MXU)
  h = edge_conv_pallas(h1, params["conv"], n_nodes_pad=n_pad, k=k, tm=tm)[:n]

  # 3) global BatchNorm + per-graph mean of node features -- glue
  u1 = batchnorm_train(u, params["bng_gamma"], params["bng_beta"])
  u2 = segment_mean(h, batch, num_graphs)
  feat = jnp.concatenate([u1, u2], axis=-1)                    # (G, global+big)

  # 4) output MLP (Pallas): pad rows to 8 and the 130-wide contraction to 256
  #    (matching the zero-padded W1 rows); final Linear lane-padded to 128.
  in_pad = params["out"][0][0].shape[0]
  g_pad = _round_up(num_graphs, 8)
  feat = jnp.pad(feat, ((0, g_pad - num_graphs), (0, in_pad - feat.shape[1])))
  out = out_mlp_pallas(feat.astype(MXU_DTYPE), params["out"])
  return out[:num_graphs, :out_dim]


# ----------------------------------------------------------------------------
if __name__ == "__main__":
  INPUT_DIM, BIG_DIM, BIGGER_DIM = 3, 128, 256
  GLOBAL_DIM, OUTPUT_DIM, K = 2, 1, 16
  N_NODES, NUM_GRAPHS = 64, 2        # two graphs of 32 nodes each (>= k per graph)

  key = jax.random.PRNGKey(0)
  kx, ku, kp = jax.random.split(key, 3)

  x = jax.random.normal(kx, (N_NODES, INPUT_DIM), jnp.float32)
  u = jax.random.normal(ku, (NUM_GRAPHS, GLOBAL_DIM), jnp.float32)
  batch = jnp.concatenate([jnp.zeros((N_NODES // 2,), jnp.int32),
                           jnp.ones((N_NODES // 2,), jnp.int32)])

  params = init_params(kp, INPUT_DIM, BIG_DIM, BIGGER_DIM, GLOBAL_DIM, OUTPUT_DIM)

  out = forward(x, batch, u, params, k=K, num_graphs=NUM_GRAPHS,
                out_dim=OUTPUT_DIM)
  out = jax.block_until_ready(out)
  assert out.shape == (NUM_GRAPHS, OUTPUT_DIM) and out.dtype == jnp.float32
  assert bool(jnp.all(jnp.isfinite(out)))
  print("KERNEL_OK")
</pallas_src>

<mosaic_0001>
module attributes {stable_mosaic.version = 11 : i64} {
  func.func private @main(%arg0: i32) attributes {dimension_semantics = [#tpu.dimension_semantics<core_parallel>], iteration_bounds = array<i64: 2>, tpu.core_type = #tpu.core_type<sc_scalar_subcore>, window_params = []} {
    return
  }
}

module attributes {stable_mosaic.version = 11 : i64} {
  func.func private @main(%arg0: i32) attributes {dimension_semantics = [#tpu.dimension_semantics<core_parallel>], iteration_bounds = array<i64: 2>, tpu.core_type = #tpu.core_type<sc_scalar_subcore>, window_params = []} {
    return
  }
}

module attributes {stable_mosaic.version = 11 : i64} {
  func.func @_edge_mlp_kernel(%arg0: i32, %arg1: memref<1024x128xbf16, #tpu.memory_space<vmem>>, %arg2: memref<128x128xbf16, #tpu.memory_space<vmem>>, %arg3: memref<1x128xf32, #tpu.memory_space<vmem>>, %arg4: memref<128x128xbf16, #tpu.memory_space<vmem>>, %arg5: memref<1x128xf32, #tpu.memory_space<vmem>>, %arg6: memref<64x128xf32, #tpu.memory_space<vmem>>) attributes {dimension_semantics = [#tpu.dimension_semantics<parallel>], iteration_bounds = array<i64: 1>, scalar_prefetch = 0 : i64, scratch_operands = 0 : i64, tpu.core_type = #tpu.core_type<tc>, window_params = [{transform_indices = @transform_0, window_bounds = array<i64: 1024, 128>}, {pipeline_mode = #tpu.pipeline_mode<synchronous>, transform_indices = @transform_1, window_bounds = array<i64: 128, 128>}, {pipeline_mode = #tpu.pipeline_mode<synchronous>, transform_indices = @transform_2, window_bounds = array<i64: 1, 128>}, {pipeline_mode = #tpu.pipeline_mode<synchronous>, transform_indices = @transform_3, window_bounds = array<i64: 128, 128>}, {pipeline_mode = #tpu.pipeline_mode<synchronous>, transform_indices = @transform_4, window_bounds = array<i64: 1, 128>}, {transform_indices = @transform_5, window_bounds = array<i64: 64, 128>}]} {
    %c0 = arith.constant 0 : index
    %c0_0 = arith.constant 0 : index
    %0 = vector.load %arg1[%c0, %c0_0] : memref<1024x128xbf16, #tpu.memory_space<vmem>>, vector<1024x128xbf16>
    %c0_1 = arith.constant 0 : index
    %c0_2 = arith.constant 0 : index
    %1 = vector.load %arg2[%c0_1, %c0_2] : memref<128x128xbf16, #tpu.memory_space<vmem>>, vector<128x128xbf16>
    %cst = arith.constant dense<0.000000e+00> : vector<1024x128xf32>
    %2 = tpu.matmul %0, %1, %cst {dimension_numbers = #tpu.dot_dimension_numbers<[1], [0], [0], [1], [0, 0, 1, 1], [], []>} : vector<1024x128xbf16>, vector<128x128xbf16>, vector<1024x128xf32> -> vector<1024x128xf32>
    %c0_3 = arith.constant 0 : index
    %c0_4 = arith.constant 0 : index
    %3 = vector.load %arg3[%c0_3, %c0_4] : memref<1x128xf32, #tpu.memory_space<vmem>>, vector<1x128xf32>
    %4 = vector.broadcast %3 : vector<1x128xf32> to vector<1024x128xf32>
    %5 = arith.addf %2, %4 : vector<1024x128xf32>
    %cst_5 = arith.constant 0.000000e+00 : f32
    %6 = vector.broadcast %cst_5 : f32 to vector<1024x128xf32>
    %7 = arith.maximumf %5, %6 : vector<1024x128xf32>
    %8 = vector.shape_cast %7 : vector<1024x128xf32> to vector<64x16x128xf32>
    %cst_6 = arith.constant dense<0.000000e+00> : vector<64x128xf32>
    %9 = vector.multi_reduction <add>, %8, %cst_6 [1] : vector<64x16x128xf32> to vector<64x128xf32>
    %cst_7 = arith.constant 6.250000e-02 : f32
    %10 = vector.broadcast %cst_7 : f32 to vector<64x128xf32>
    %11 = arith.mulf %9, %10 : vector<64x128xf32>
    %12 = arith.truncf %11 : vector<64x128xf32> to vector<64x128xbf16>
    %c0_8 = arith.constant 0 : index
    %c0_9 = arith.constant 0 : index
    %13 = vector.load %arg4[%c0_8, %c0_9] : memref<128x128xbf16, #tpu.memory_space<vmem>>, vector<128x128xbf16>
    %cst_10 = arith.constant dense<0.000000e+00> : vector<64x128xf32>
    %14 = tpu.matmul %12, %13, %cst_10 {dimension_numbers = #tpu.dot_dimension_numbers<[1], [0], [0], [1], [0, 0, 1, 1], [], []>} : vector<64x128xbf16>, vector<128x128xbf16>, vector<64x128xf32> -> vector<64x128xf32>
    %c0_11 = arith.constant 0 : index
    %c0_12 = arith.constant 0 : index
    %15 = vector.load %arg5[%c0_11, %c0_12] : memref<1x128xf32, #tpu.memory_space<vmem>>, vector<1x128xf32>
    %16 = vector.broadcast %15 : vector<1x128xf32> to vector<64x128xf32>
    %17 = arith.addf %14, %16 : vector<64x128xf32>
    %c0_13 = arith.constant 0 : index
    %c0_14 = arith.constant 0 : index
    %18 = vector.load %arg6[%c0_13, %c0_14] : memref<64x128xf32, #tpu.memory_space<vmem>>, vector<64x128xf32>
    tpu.vector_store %arg6[%c0_13, %c0_14], %17 {strides = array<i32>} : memref<64x128xf32, #tpu.memory_space<vmem>>, vector<64x128xf32>,
    return
  }
  func.func @transform_0(%arg0: i32) -> (i32, i32) {
    %c0_i32 = arith.constant 0 : i32
    %c0_i32_0 = arith.constant 0 : i32
    return %arg0, %c0_i32 : i32, i32
  }
  func.func @transform_1(%arg0: i32) -> (i32, i32) {
    %c0_i32 = arith.constant 0 : i32
    %c0_i32_0 = arith.constant 0 : i32
    %c0_i32_1 = arith.constant 0 : i32
    return %c0_i32, %c0_i32_0 : i32, i32
  }
  func.func @transform_2(%arg0: i32) -> (i32, i32) {
    %c0_i32 = arith.constant 0 : i32
    %c0_i32_0 = arith.constant 0 : i32
    %c0_i32_1 = arith.constant 0 : i32
    return %c0_i32, %c0_i32_0 : i32, i32
  }
  func.func @transform_3(%arg0: i32) -> (i32, i32) {
    %c0_i32 = arith.constant 0 : i32
    %c0_i32_0 = arith.constant 0 : i32
    %c0_i32_1 = arith.constant 0 : i32
    return %c0_i32, %c0_i32_0 : i32, i32
  }
  func.func @transform_4(%arg0: i32) -> (i32, i32) {
    %c0_i32 = arith.constant 0 : i32
    %c0_i32_0 = arith.constant 0 : i32
    %c0_i32_1 = arith.constant 0 : i32
    return %c0_i32, %c0_i32_0 : i32, i32
  }
  func.func @transform_5(%arg0: i32) -> (i32, i32) {
    %c0_i32 = arith.constant 0 : i32
    %c0_i32_0 = arith.constant 0 : i32
    return %arg0, %c0_i32 : i32, i32
  }
}

module attributes {stable_mosaic.version = 11 : i64} {
  func.func @_out_mlp_kernel(%arg0: memref<8x256xbf16, #tpu.memory_space<vmem>>, %arg1: memref<256x256xbf16, #tpu.memory_space<vmem>>, %arg2: memref<1x256xf32, #tpu.memory_space<vmem>>, %arg3: memref<256x256xbf16, #tpu.memory_space<vmem>>, %arg4: memref<1x256xf32, #tpu.memory_space<vmem>>, %arg5: memref<256x128xbf16, #tpu.memory_space<vmem>>, %arg6: memref<1x128xf32, #tpu.memory_space<vmem>>, %arg7: memref<8x128xf32, #tpu.memory_space<vmem>>) attributes {dimension_semantics = [], scalar_prefetch = 0 : i64, scratch_operands = 0 : i64, tpu.core_type = #tpu.core_type<tc>} {
    %c0 = arith.constant 0 : index
    %c0_0 = arith.constant 0 : index
    %0 = vector.load %arg0[%c0, %c0_0] : memref<8x256xbf16, #tpu.memory_space<vmem>>, vector<8x256xbf16>
    %c0_1 = arith.constant 0 : index
    %c0_2 = arith.constant 0 : index
    %1 = vector.load %arg1[%c0_1, %c0_2] : memref<256x256xbf16, #tpu.memory_space<vmem>>, vector<256x256xbf16>
    %cst = arith.constant dense<0.000000e+00> : vector<8x256xf32>
    %2 = tpu.matmul %0, %1, %cst {dimension_numbers = #tpu.dot_dimension_numbers<[1], [0], [0], [1], [0, 0, 1, 1], [], []>} : vector<8x256xbf16>, vector<256x256xbf16>, vector<8x256xf32> -> vector<8x256xf32>
    %c0_3 = arith.constant 0 : index
    %c0_4 = arith.constant 0 : index
    %3 = vector.load %arg2[%c0_3, %c0_4] : memref<1x256xf32, #tpu.memory_space<vmem>>, vector<1x256xf32>
    %4 = vector.broadcast %3 : vector<1x256xf32> to vector<8x256xf32>
    %5 = arith.addf %2, %4 : vector<8x256xf32>
    %cst_5 = arith.constant 0.000000e+00 : f32
    %6 = vector.broadcast %cst_5 : f32 to vector<8x256xf32>
    %7 = arith.maximumf %5, %6 : vector<8x256xf32>
    %8 = arith.truncf %7 : vector<8x256xf32> to vector<8x256xbf16>
    %c0_6 = arith.constant 0 : index
    %c0_7 = arith.constant 0 : index
    %9 = vector.load %arg3[%c0_6, %c0_7] : memref<256x256xbf16, #tpu.memory_space<vmem>>, vector<256x256xbf16>
    %cst_8 = arith.constant dense<0.000000e+00> : vector<8x256xf32>
    %10 = tpu.matmul %8, %9, %cst_8 {dimension_numbers = #tpu.dot_dimension_numbers<[1], [0], [0], [1], [0, 0, 1, 1], [], []>} : vector<8x256xbf16>, vector<256x256xbf16>, vector<8x256xf32> -> vector<8x256xf32>
    %c0_9 = arith.constant 0 : index
    %c0_10 = arith.constant 0 : index
    %11 = vector.load %arg4[%c0_9, %c0_10] : memref<1x256xf32, #tpu.memory_space<vmem>>, vector<1x256xf32>
    %12 = vector.broadcast %11 : vector<1x256xf32> to vector<8x256xf32>
    %13 = arith.addf %10, %12 : vector<8x256xf32>
    %cst_11 = arith.constant 0.000000e+00 : f32
    %14 = vector.broadcast %cst_11 : f32 to vector<8x256xf32>
    %15 = arith.maximumf %13, %14 : vector<8x256xf32>
    %16 = arith.truncf %15 : vector<8x256xf32> to vector<8x256xbf16>
    %c0_12 = arith.constant 0 : index
    %c0_13 = arith.constant 0 : index
    %17 = vector.load %arg5[%c0_12, %c0_13] : memref<256x128xbf16, #tpu.memory_space<vmem>>, vector<256x128xbf16>
    %cst_14 = arith.constant dense<0.000000e+00> : vector<8x128xf32>
    %18 = tpu.matmul %16, %17, %cst_14 {dimension_numbers = #tpu.dot_dimension_numbers<[1], [0], [0], [1], [0, 0, 1, 1], [], []>} : vector<8x256xbf16>, vector<256x128xbf16>, vector<8x128xf32> -> vector<8x128xf32>
    %c0_15 = arith.constant 0 : index
    %c0_16 = arith.constant 0 : index
    %19 = vector.load %arg6[%c0_15, %c0_16] : memref<1x128xf32, #tpu.memory_space<vmem>>, vector<1x128xf32>
    %20 = vector.broadcast %19 : vector<1x128xf32> to vector<8x128xf32>
    %21 = arith.addf %18, %20 : vector<8x128xf32>
    %c0_17 = arith.constant 0 : index
    %c0_18 = arith.constant 0 : index
    %22 = vector.load %arg7[%c0_17, %c0_18] : memref<8x128xf32, #tpu.memory_space<vmem>>, vector<8x128xf32>
    tpu.vector_store %arg7[%c0_17, %c0_18], %21 {strides = array<i32>} : memref<8x128xf32, #tpu.memory_space<vmem>>, vector<8x128xf32>,
    return
  }
}

</mosaic_0001>

<bundles_post_ra>
// kernel: forward.2
= control target key start
LH: loop header
LB: loop body
LE: loop exit
PB: predicated region body
PF: predicated region fallthrough
CT: control target
= control target key end

     0   :  { %vm2004_vm0 = vcmask 1041409   ;;  %vm2006_vm1 = vcmask 1042434   ;;  %vm2008_vm2 = vcmask 1043459   ;;  %vm2010_vm3 = vcmask 1044484   ;;  %s3608_s1 = inlined_call_operand.vmem [shape: bf16[128,128], index: 1, kind: input, shape index: {}]   ;;  %s3609_s0 = inlined_call_operand.vmem [shape: bf16[1024,128], index: 0, kind: input, shape index: {}]   ;;  %s3610_s3 = inlined_call_operand.vmem [shape: bf16[128,128], index: 3, kind: input, shape index: {}]   ;;  %s3611_s2 = inlined_call_operand.vmem [shape: f32[1,128], index: 2, kind: input, shape index: {}]   ;;  %s3612_s4 = inlined_call_operand.vmem [shape: f32[1,128], index: 4, kind: input, shape index: {}]   ;;  %s3613_s5 = inlined_call_operand.vmem [shape: f32[64,128], index: 5, kind: output, shape index: {}]  }
   0x1   :  { %v2550_v0 = vld [vmem:[%s3608_s1] sm:$0xff]   ;;  %v2551_v1 = vld [vmem:[%s3608_s1 + $0x8] sm:$0xff]   ;;  %v2552_v2 = vld [vmem:[%s3608_s1 + $0x10] sm:$0xff]   ;;  %vm2012_vm4 = vcmask 1045509   ;;  %vm2014_vm5 = vcmask 1046534   ;;  %vm2016_vm6 = vcmask 1047559  }
   0x2   :  { %2366 = vmatprep.subr.bf16.mxu0 %v2550_v0  ;;  %2534 = vmatprep.subr.bf16.mxu1 %v2550_v0  ;;  %v2553_v3 = vld [vmem:[%s3608_s1 + $0x18] sm:$0xff]   ;;  %v2558_v4 = vld [vmem:[%s3609_s0] sm:$0xff]   ;;  %v2559_v5 = vld [vmem:[%s3609_s0 + $0x110] sm:$0xff]  }
   0x3   :  { %2367 = vmatpush3.bf16.msra.mxu0 %v2550_v0  ;;  %2542 = vmatpush3.bf16.msra.mxu1 %v2550_v0  ;;  %v2554_v6 = vld [vmem:[%s3608_s1 + $0x20] sm:$0xff]   ;;  %v2555_v7 = vld [vmem:[%s3608_s1 + $0x28] sm:$0xff]   ;;  %v2556_v8 = vld [vmem:[%s3608_s1 + $0x30] sm:$0xff]  }
   0x4   :  { %2368 = vmatprep.subr.bf16.mxu0 %v2551_v1  ;;  %2535 = vmatprep.subr.bf16.mxu1 %v2551_v1  ;;  %v2557_v9 = vld [vmem:[%s3608_s1 + $0x38] sm:$0xff]   ;;  %v2560_v10 = vld [vmem:[%s3609_s0 + $0x8] sm:$0xff]   ;;  %v2562_v12 = vld [vmem:[%s3609_s0 + $0x10] sm:$0xff]  }
   0x5   :  { %2382 = vmatprep.mubr.bf16.mxu0 %v2558_v4  ;;  %2450 = vmatprep.mubr.bf16.mxu1 %v2559_v5  ;;  %v2561_v11 = vld [vmem:[%s3609_s0 + $0x118] sm:$0xff]   ;;  %v2563_v13 = vld [vmem:[%s3609_s0 + $0x120] sm:$0xff]   ;;  %v2565_v15 = vld [vmem:[%s3609_s0 + $0x128] sm:$0xff]  }
   0x6   :  { %v2564_v14 = vld [vmem:[%s3609_s0 + $0x18] sm:$0xff]   ;;  %v2566_v16 = vld [vmem:[%s3609_s0 + $0x20] sm:$0xff]   ;;  %v2567_v17 = vld [vmem:[%s3609_s0 + $0x130] sm:$0xff]  }
   0x7   :  { %2369 = vmatpush3.bf16.msra.mxu0 %v2551_v1  ;;  %2543 = vmatpush3.bf16.msra.mxu1 %v2551_v1  ;;  %v2568_v18 = vld [vmem:[%s3609_s0 + $0x28] sm:$0xff]   ;;  %v2569_v19 = vld [vmem:[%s3609_s0 + $0x138] sm:$0xff]   ;;  %v2570_v20 = vld [vmem:[%s3609_s0 + $0x30] sm:$0xff]  }
   0x8   :  { %2370 = vmatprep.subr.bf16.mxu0 %v2552_v2  ;;  %2536 = vmatprep.subr.bf16.mxu1 %v2552_v2  ;;  %v2571_v21 = vld [vmem:[%s3609_s0 + $0x140] sm:$0xff]   ;;  %v2572_v22 = vld [vmem:[%s3609_s0 + $0x38] sm:$0xff]   ;;  %v2573_v23 = vld [vmem:[%s3609_s0 + $0x148] sm:$0xff]  }
   0x9   :  { %v2574_v24 = vld [vmem:[%s3609_s0 + $0x40] sm:$0xff]   ;;  %v2575_v25 = vld [vmem:[%s3609_s0 + $0x150] sm:$0xff]   ;;  %v2576_v26 = vld [vmem:[%s3609_s0 + $0x48] sm:$0xff]  }
   0xa   :  { %v2577_v27 = vld [vmem:[%s3609_s0 + $0x158] sm:$0xff]   ;;  %v2578_v28 = vld [vmem:[%s3609_s0 + $0x50] sm:$0xff]   ;;  %v2579_v29 = vld [vmem:[%s3609_s0 + $0x160] sm:$0xff]  }
   0xb   :  { %2371 = vmatpush3.bf16.msra.mxu0 %v2552_v2  ;;  %2544 = vmatpush3.bf16.msra.mxu1 %v2552_v2  ;;  %v2580_v30 = vld [vmem:[%s3609_s0 + $0x58] sm:$0xff]   ;;  %v2581_v31 = vld [vmem:[%s3609_s0 + $0x168] sm:$0xff]   ;;  %v2582_v32 = vld [vmem:[%s3609_s0 + $0x60] sm:$0xff]  }
   0xc   :  { %2372 = vmatprep.subr.bf16.mxu0 %v2553_v3  ;;  %2537 = vmatprep.subr.bf16.mxu1 %v2553_v3  ;;  %v2583_v33 = vld [vmem:[%s3609_s0 + $0x170] sm:$0xff]   ;;  %v2584_v34 = vld [vmem:[%s3609_s0 + $0x68] sm:$0xff]   ;;  %v2585_v35 = vld [vmem:[%s3609_s0 + $0x178] sm:$0xff]  }
   0xd   :  { %v2586_v36 = vld [vmem:[%s3609_s0 + $0x70] sm:$0xff]   ;;  %v2587_v37 = vld [vmem:[%s3609_s0 + $0x180] sm:$0xff]   ;;  %v2588_v38 = vld [vmem:[%s3609_s0 + $0x78] sm:$0xff]  }
   0xe   :  { %v2589_v39 = vld [vmem:[%s3609_s0 + $0x188] sm:$0xff]   ;;  %v2590_v40 = vld [vmem:[%s3609_s0 + $0x80] sm:$0xff]   ;;  %v2591_v41 = vld [vmem:[%s3609_s0 + $0x190] sm:$0xff]  }
   0xf   :  { %2373 = vmatpush3.bf16.msra.mxu0 %v2553_v3  ;;  %2545 = vmatpush3.bf16.msra.mxu1 %v2553_v3  ;;  %v2592_v42 = vld [vmem:[%s3609_s0 + $0x88] sm:$0xff]   ;;  %v2593_v43 = vld [vmem:[%s3609_s0 + $0x198] sm:$0xff]   ;;  %v2594_v44 = vld [vmem:[%s3609_s0 + $0x90] sm:$0xff]  }
  0x10   :  { %2374 = vmatprep.subr.bf16.mxu0 %v2554_v6  ;;  %2538 = vmatprep.subr.bf16.mxu1 %v2554_v6  ;;  %v2595_v45 = vld [vmem:[%s3609_s0 + $0x1a0] sm:$0xff]   ;;  %v2596_v46 = vld [vmem:[%s3609_s0 + $0x98] sm:$0xff]   ;;  %v2597_v47 = vld [vmem:[%s3609_s0 + $0x1a8] sm:$0xff]  }
  0x11   :  { %v2598_v48 = vld [vmem:[%s3609_s0 + $0xa0] sm:$0xff]   ;;  %v2599_v49 = vld [vmem:[%s3609_s0 + $0x1b0] sm:$0xff]   ;;  %v2600_v50 = vld [vmem:[%s3609_s0 + $0xa8] sm:$0xff]  }
  0x12   :  { %v2601_v51 = vld [vmem:[%s3609_s0 + $0x1b8] sm:$0xff]   ;;  %v2602_v52 = vld [vmem:[%s3609_s0 + $0xb0] sm:$0xff]   ;;  %v2603_v53 = vld [vmem:[%s3609_s0 + $0x1c0] sm:$0xff]  }
  0x13   :  { %2375 = vmatpush3.bf16.msra.mxu0 %v2554_v6  ;;  %2546 = vmatpush3.bf16.msra.mxu1 %v2554_v6  ;;  %v2604_v54 = vld [vmem:[%s3609_s0 + $0xb8] sm:$0xff]   ;;  %v2605_v55 = vld [vmem:[%s3609_s0 + $0x1c8] sm:$0xff]   ;;  %v2606_v56 = vld [vmem:[%s3609_s0 + $0xc0] sm:$0xff]  }
  0x14   :  { %2376 = vmatprep.subr.bf16.mxu0 %v2555_v7  ;;  %2539 = vmatprep.subr.bf16.mxu1 %v2555_v7  ;;  %v2607_v57 = vld [vmem:[%s3609_s0 + $0x1d0] sm:$0xff]   ;;  %v2608_v58 = vld [vmem:[%s3609_s0 + $0xc8] sm:$0xff]   ;;  %v2609_v59 = vld [vmem:[%s3609_s0 + $0x1d8] sm:$0xff]  }
  0x15   :  { %v2610_v60 = vld [vmem:[%s3609_s0 + $0xd0] sm:$0xff]   ;;  %v2611_v61 = vld [vmem:[%s3609_s0 + $0x1e0] sm:$0xff]   ;;  %v2612_v62 = vld [vmem:[%s3609_s0 + $0xd8] sm:$0xff]  }
  0x16   :  { %v2613_v63 = vld [vmem:[%s3609_s0 + $0x1e8] sm:$0xff]   ;;  %v2614_v0 = vld [vmem:[%s3609_s0 + $0xe0] sm:$0xff]   ;;  %v2615_v1 = vld [vmem:[%s3609_s0 + $0x1f0] sm:$0xff]  }
  0x17   :  { %2377 = vmatpush3.bf16.msra.mxu0 %v2555_v7  ;;  %2547 = vmatpush3.bf16.msra.mxu1 %v2555_v7  ;;  %v2616_v2 = vld [vmem:[%s3609_s0 + $0xe8] sm:$0xff]   ;;  %v2617_v3 = vld [vmem:[%s3609_s0 + $0x1f8] sm:$0xff]   ;;  %v2618_v4 = vld [vmem:[%s3609_s0 + $0xf0] sm:$0xff]  }
  0x18   :  { %2378 = vmatprep.subr.bf16.mxu0 %v2556_v8  ;;  %2540 = vmatprep.subr.bf16.mxu1 %v2556_v8  ;;  %v2619_v5 = vld [vmem:[%s3609_s0 + $0xf8] sm:$0xff]   ;;  %v2620_v6 = vld [vmem:[%s3609_s0 + $0x100] sm:$0xff]   ;;  %v2621_v7 = vld [vmem:[%s3609_s0 + $0x108] sm:$0xff]  }
  0x1b   :  { %2379 = vmatpush3.bf16.msra.mxu0 %v2556_v8  ;;  %2548 = vmatpush3.bf16.msra.mxu1 %v2556_v8  ;;  %v2622_v8 = vld [vmem:[%s3610_s3] sm:$0xff]  }
  0x1c   :  { %2380 = vmatprep.subr.bf16.mxu0 %v2557_v9  ;;  %2541 = vmatprep.subr.bf16.mxu1 %v2557_v9 }
  0x1f   :  { %2381 = vmatpush3.bf16.msra.mxu0 %v2557_v9  ;;  %2549 = vmatpush3.bf16.msra.mxu1 %v2557_v9  ;;  %v2623_v9 = vld [vmem:[%s3610_s3 + $0x8] sm:$0xff]  }
  0x20   :  { %2510 = vmatprep.subr.bf16.mxu1 %v2622_v8 }
  0x22   :  { %2383 = vmatmul.mubr.bf16.vlgmr.msra.gmra.mrb[0].mxu0 %v2560_v10  ;;  %2451 = vmatmul.mubr.bf16.vlgmr.msra.gmra.mrb[0].mxu1 %v2561_v11  ;;  %v2886_v10 = vld [vmem:[%s3611_s2] ss:$0 sm:$0xff] }
  0x23   :  { %2386 = vmatprep.mubr.bf16.mxu0 %v2562_v12  ;;  %2454 = vmatprep.mubr.bf16.mxu1 %v2563_v13 }
  0x24   :  { %2511 = vmatpush3.bf16.msra.mxu1 %v2622_v8 }
  0x25   :  { %2512 = vmatprep.subr.bf16.mxu1 %v2623_v9 }
  0x28   :  { %2513 = vmatpush3.bf16.msra.mxu1 %v2623_v9 }
  0x2a   :  { %2387 = vmatmul.mubr.bf16.gmra.mrb[4].mxu0 %v2564_v14  ;;  %2455 = vmatmul.mubr.bf16.gmra.mrb[4].mxu1 %v2565_v15 }
  0x2b   :  { %2390 = vmatprep.mubr.bf16.mxu0 %v2566_v16  ;;  %2458 = vmatprep.mubr.bf16.mxu1 %v2567_v17 }
  0x32   :  { %2391 = vmatmul.mubr.bf16.gmra.mrb[8].mxu0 %v2568_v18  ;;  %2459 = vmatmul.mubr.bf16.gmra.mrb[8].mxu1 %v2569_v19 }
  0x33   :  { %2394 = vmatprep.mubr.bf16.mxu0 %v2570_v20  ;;  %2462 = vmatprep.mubr.bf16.mxu1 %v2571_v21 }
  0x3a   :  { %2395 = vmatmul.mubr.bf16.gmra.mrb[12].mxu0 %v2572_v22  ;;  %2463 = vmatmul.mubr.bf16.gmra.mrb[12].mxu1 %v2573_v23 }
  0x3b   :  { %2398 = vmatprep.mubr.bf16.mxu0 %v2574_v24  ;;  %2466 = vmatprep.mubr.bf16.mxu1 %v2575_v25 }
  0x42   :  { %2399 = vmatmul.mubr.bf16.gmra.mrb[16].mxu0 %v2576_v26  ;;  %2467 = vmatmul.mubr.bf16.gmra.mrb[16].mxu1 %v2577_v27 }
  0x43   :  { %2402 = vmatprep.mubr.bf16.mxu0 %v2578_v28  ;;  %2470 = vmatprep.mubr.bf16.mxu1 %v2579_v29 }
  0x4a   :  { %2403 = vmatmul.mubr.bf16.gmra.mrb[20].mxu0 %v2580_v30  ;;  %2471 = vmatmul.mubr.bf16.gmra.mrb[20].mxu1 %v2581_v31 }
  0x4b   :  { %2406 = vmatprep.mubr.bf16.mxu0 %v2582_v32  ;;  %2474 = vmatprep.mubr.bf16.mxu1 %v2583_v33  ;;  %v2624_v32 = vld [vmem:[%s3610_s3 + $0x10] sm:$0xff]  }
  0x4c   :  { %2514 = vmatprep.subr.bf16.mxu1 %v2624_v32 }
  0x4d   :  { %2515 = vmatpush3.bf16.msra.mxu1 %v2624_v32 }
  0x52   :  { %2407 = vmatmul.mubr.bf16.gmra.mrb[24].mxu0 %v2584_v34  ;;  %2475 = vmatmul.mubr.bf16.gmra.mrb[24].mxu1 %v2585_v35 }
  0x53   :  { %2410 = vmatprep.mubr.bf16.mxu0 %v2586_v36  ;;  %2478 = vmatprep.mubr.bf16.mxu1 %v2587_v37 }
  0x5a   :  { %2411 = vmatmul.mubr.bf16.gmra.mrb[28].mxu0 %v2588_v38  ;;  %2479 = vmatmul.mubr.bf16.gmra.mrb[28].mxu1 %v2589_v39 }
  0x5b   :  { %2414 = vmatprep.mubr.bf16.mxu0 %v2590_v40  ;;  %2482 = vmatprep.mubr.bf16.mxu1 %v2591_v41 }
  0x62   :  { %2415 = vmatmul.mubr.bf16.gmra.mrb[32].mxu0 %v2592_v42  ;;  %2483 = vmatmul.mubr.bf16.gmra.mrb[32].mxu1 %v2593_v43 }
  0x63   :  { %2418 = vmatprep.mubr.bf16.mxu0 %v2594_v44  ;;  %2486 = vmatprep.mubr.bf16.mxu1 %v2595_v45 }
  0x6a   :  { %2419 = vmatmul.mubr.bf16.gmra.mrb[36].mxu0 %v2596_v46  ;;  %2487 = vmatmul.mubr.bf16.gmra.mrb[36].mxu1 %v2597_v47 }
  0x6b   :  { %2422 = vmatprep.mubr.bf16.mxu0 %v2598_v48  ;;  %2490 = vmatprep.mubr.bf16.mxu1 %v2599_v49 }
  0x72   :  { %2423 = vmatmul.mubr.bf16.gmra.mrb[40].mxu0 %v2600_v50  ;;  %2491 = vmatmul.mubr.bf16.gmra.mrb[40].mxu1 %v2601_v51 }
  0x73   :  { %2426 = vmatprep.mubr.bf16.mxu0 %v2602_v52  ;;  %2494 = vmatprep.mubr.bf16.mxu1 %v2603_v53 }
  0x7a   :  { %2427 = vmatmul.mubr.bf16.gmra.mrb[44].mxu0 %v2604_v54  ;;  %2495 = vmatmul.mubr.bf16.gmra.mrb[44].mxu1 %v2605_v55 }
  0x7b   :  { %2430 = vmatprep.mubr.bf16.mxu0 %v2606_v56  ;;  %2498 = vmatprep.mubr.bf16.mxu1 %v2607_v57 }
  0x82   :  { %2431 = vmatmul.mubr.bf16.gmra.mrb[48].mxu0 %v2608_v58  ;;  %2499 = vmatmul.mubr.bf16.gmra.mrb[48].mxu1 %v2609_v59 }
  0x83   :  { %2434 = vmatprep.mubr.bf16.mxu0 %v2610_v60  ;;  %2502 = vmatprep.mubr.bf16.mxu1 %v2611_v61 }
  0x8a   :  { %2435 = vmatmul.mubr.bf16.gmra.mrb[52].mxu0 %v2612_v62  ;;  %2503 = vmatmul.mubr.bf16.gmra.mrb[52].mxu1 %v2613_v63 }
  0x8b   :  { %2438 = vmatprep.mubr.bf16.mxu0 %v2614_v0  ;;  %2506 = vmatprep.mubr.bf16.mxu1 %v2615_v1 }
  0x92   :  { %2439 = vmatmul.mubr.bf16.gmra.mrb[56].mxu0 %v2616_v2  ;;  %2507 = vmatmul.mubr.bf16.gmra.mrb[56].mxu1 %v2617_v3 }
  0x93   :  { %2442 = vmatprep.mubr.bf16.mxu0 %v2618_v4 }
  0x9a   :  { %2443 = vmatmul.mubr.bf16.gmra.mrb[60].mxu0 %v2619_v5 }
  0x9b   :  { %2446 = vmatprep.mubr.bf16.mxu0 %v2620_v6 }
  0xa2   :  { %2447 = vmatmul.mubr.bf16.gmra.mrb[64].mxu0 %v2621_v7 }
  0xf5   :  { %v2384_v11 = vpop.f32.mrb[0].mxu0  ;;  %v2452_v12 = vpop.f32.mrb[0].mxu1 }
  0xf6   :  { %v647_v13 = vadd.f32 %v2384_v11, %v2886_v10  ;;  %v638_v14 = vpop.f32.mrb[1].mxu0  ;;  %v919_v15 = vadd.f32 %v2452_v12, %v2886_v10  ;;  %v910_v16 = vpop.f32.mrb[1].mxu1 }
  0xf7   :  { %v639_v17 = vadd.f32 %v2886_v10, %v638_v14  ;;  %v2385_v18 = vpop.f32.mrb[2].mxu0  ;;  %v911_v19 = vadd.f32 %v2886_v10, %v910_v16  ;;  %v2453_v20 = vpop.f32.mrb[2].mxu1 }
  0xf8   :  { %v650_v21 = vadd.f32 %v2385_v18, %v2886_v10  ;;  %v641_v22 = vpop.f32.mrb[3].mxu0  ;;  %v1219_v23 = vmax.f32 %v919_v15, 0.0  ;;  %v922_v24 = vadd.f32 %v2453_v20, %v2886_v10  ;;  %v913_v25 = vpop.f32.mrb[3].mxu1  ;;  %v1151_v29 = vmax.f32 %v647_v13, 0.0 }
  0xf9   :  { %v642_v26 = vadd.f32 %v2886_v10, %v641_v22  ;;  %v1217_v27 = vmax.f32 %v911_v19, 0.0  ;;  %v914_v28 = vadd.f32 %v2886_v10, %v913_v25  ;;  %v1149_v33 = vmax.f32 %v639_v17, 0.0 }
  0xfa   :  { %v1152_v30 = vmax.f32 %v650_v21, 0.0  ;;  %v1220_v31 = vmax.f32 %v922_v24, 0.0 }
  0xfb   :  { %v1150_v34 = vmax.f32 %v642_v26, 0.0  ;;  %v1218_v35 = vmax.f32 %v914_v28, 0.0 }
  0xfc   :  { %v1284_v36 = vadd.f32 %v1152_v30, %v1151_v29  ;;  %v1522_v37 = vadd.f32 %v1220_v31, %v1219_v23 }
  0xfd   :  { %v1277_v38 = vadd.f32 %v1150_v34, %v1149_v33  ;;  %v2388_v39 = vpop.f32.mrb[4].mxu0  ;;  %v2899_v40 = vadd.f32 %v1218_v35, %v1217_v27  ;;  %v2456_v41 = vpop.f32.mrb[4].mxu1 }
  0xfe   :  { %v1285_v42 = vrot.slane %v1284_v36, 4  ;;  %v663_v43 = vadd.f32 %v2388_v39, %v2886_v10  ;;  %v654_v44 = vpop.f32.mrb[5].mxu0  ;;  %v926_v45 = vpop.f32.mrb[5].mxu1  ;;  %v1523_v6 = vrot.slane %v1522_v37, 4  ;;  %v935_v13 = vadd.f32 %v2456_v41, %v2886_v10 }
  0xff   :  { %v1278_v46 = vrot.slane %v1277_v38, 4  ;;  %v655_v47 = vadd.f32 %v2886_v10, %v654_v44  ;;  %v2389_v48 = vpop.f32.mrb[6].mxu0  ;;  %v2457_v49 = vpop.f32.mrb[6].mxu1  ;;  %v1516_v18 = vrot.slane %v2899_v40, 4  ;;  %v927_v24 = vadd.f32 %v2886_v10, %v926_v45 }
 0x100   :  { %v1286_v50 = vadd.f32 %v1285_v42, %v1284_v36  ;;  %v666_v51 = vadd.f32 %v2389_v48, %v2886_v10  ;;  %v657_v52 = vpop.f32.mrb[7].mxu0  ;;  %v929_v53 = vpop.f32.mrb[7].mxu1  ;;  %v1155_v57 = vmax.f32 %v663_v43, 0.0  ;;  %v1524_v26 = vadd.f32 %v1523_v6, %v1522_v37 }
 0x101   :  { %v1279_v54 = vadd.f32 %v1278_v46, %v1277_v38  ;;  %v658_v55 = vadd.f32 %v2886_v10, %v657_v52  ;;  %v1153_v60 = vmax.f32 %v655_v47, 0.0  ;;  %v938_v28 = vadd.f32 %v2457_v49, %v2886_v10 }
 0x102   :  { %v1287_v56 = vrot.slane %v1286_v50, 2  ;;  %v1156_v58 = vmax.f32 %v666_v51, 0.0  ;;  %v930_v32 = vadd.f32 %v2886_v10, %v929_v53  ;;  %v1517_v45 = vadd.f32 %v1516_v18, %v2899_v40 }
 0x103   :  { %v1280_v59 = vrot.slane %v1279_v54, 2  ;;  %v1154_v61 = vmax.f32 %v658_v55, 0.0  ;;  %v1223_v47 = vmax.f32 %v935_v13, 0.0  ;;  %v1221_v53 = vmax.f32 %v927_v24, 0.0 }
 0x104   :  { %v1288_v62 = vadd.f32 %v1287_v56, %v1286_v50  ;;  %v1298_v63 = vadd.f32 %v1156_v58, %v1155_v57  ;;  %v1224_v58 = vmax.f32 %v938_v28, 0.0  ;;  %v1518_v6 = vrot.slane %v1517_v45, 2 }
 0x105   :  { %v1281_v0 = vadd.f32 %v1280_v59, %v1279_v54  ;;  %v1291_v1 = vadd.f32 %v1154_v61, %v1153_v60  ;;  %v2392_v2 = vpop.f32.mrb[8].mxu0  ;;  %v2905_v3 = vpop.f32.mrb[8].mxu1 }
 0x106   :  { %v1289_v4 = vrot.slane %v1288_v62, 1  ;;  %v1299_v5 = vrot.slane %v1298_v63, 4  ;;  %v670_v7 = vpop.f32.mrb[9].mxu0  ;;  %v2907_v8 = vpop.f32.mrb[9].mxu1  ;;  %v679_v17 = vadd.f32 %v2392_v2, %v2886_v10  ;;  %v1536_v2 = vadd.f32 %v1224_v58, %v1223_v47 }
 0x107   :  { %v1282_v9 = vrot.slane %v1281_v0, 1  ;;  %v1292_v11 = vrot.slane %v1291_v1, 4  ;;  %v2393_v12 = vpop.f32.mrb[10].mxu0  ;;  %v2910_v14 = vpop.f32.mrb[10].mxu1  ;;  %v671_v23 = vadd.f32 %v2886_v10, %v670_v7 }
 0x108   :  { %v1290_v15 = vadd.f32 %v1289_v4, %v1288_v62  ;;  %v1300_v16 = vadd.f32 %v1299_v5, %v1298_v63  ;;  %v673_v19 = vpop.f32.mrb[11].mxu0  ;;  %v2914_v20 = vpop.f32.mrb[11].mxu1  ;;  %v682_v27 = vadd.f32 %v2393_v12, %v2886_v10  ;;  %v1159_v35 = vmax.f32 %v679_v17, 0.0 }
 0x109   :  { %v1283_v21 = vadd.f32 %v1282_v9, %v1281_v0  ;;  %v1293_v22 = vadd.f32 %v1292_v11, %v1291_v1  ;;  %v674_v31 = vadd.f32 %v2886_v10, %v673_v19  ;;  %v1157_v41 = vmax.f32 %v671_v23, 0.0 }
 0x10a   :  { %v1726_v25 = vmul.f32 0.0625, %v1290_v15  ;;  %v1301_v34 = vrot.slane %v1300_v16, 2  ;;  %v1160_v36 = vmax.f32 %v682_v27, 0.0  ;;  %v1222_v63 = vmax.f32 %v930_v32, 0.0 }
 0x10b   :  { %v1725_v29 = vmul.f32 0.0625, %v1283_v21  ;;  %v1294_v30 = vrot.slane %v1293_v22, 2  ;;  %v1158_v42 = vmax.f32 %v674_v31, 0.0  ;;  %v1525_v0 = vrot.slane %v1524_v26, 2 }
 0x10c   :  { %v1790_v33 = vpack.c.bf16 %v1726_v25, %v1726_v25  ;;  %v1312_v46 = vadd.f32 %v1160_v36, %v1159_v35  ;;  %v1302_v56 = vadd.f32 %v1301_v34, %v1300_v16  ;;  %v1529_v9 = vadd.f32 %v1222_v63, %v1221_v53 }
 0x10d   :  { %v1789_v38 = vpack.c.bf16 %v1725_v29, %v1725_v29  ;;  %v1295_v39 = vadd.f32 %v1294_v30, %v1293_v22  ;;  %v2396_v43 = vpop.f32.mrb[12].mxu0  ;;  %v2922_v37 = vpop.f32.mrb[12].mxu1  ;;  %v1305_v52 = vadd.f32 %v1158_v42, %v1157_v41  ;;  %v1537_v18 = vrot.slane %v1536_v2, 4  ;;  %v2625_v30 = vld [vmem:[%s3610_s3 + $0x18] sm:$0xff]  }
 0x10e   :  { %v1941_v44 = vunpack.c.l.b16 %v1790_v33  ;;  %v686_v48 = vpop.f32.mrb[13].mxu0  ;;  %v2925_v49 = vpop.f32.mrb[13].mxu1  ;;  %v1313_v57 = vrot.slane %v1312_v46, 4  ;;  %v695_v4 = vadd.f32 %v2396_v43, %v2886_v10  ;;  %v1303_v11 = vrot.slane %v1302_v56, 1  ;;  %2516 = vmatprep.subr.bf16.mxu1 %v2625_v30 }
 0x10f   :  { %v1940_v50 = vunpack.c.l.b16 %v1789_v38  ;;  %v1296_v51 = vrot.slane %v1295_v39, 1  ;;  %v2397_v54 = vpop.f32.mrb[14].mxu0  ;;  %v2927_v55 = vpop.f32.mrb[14].mxu1  ;;  %v1306_v62 = vrot.slane %v1305_v52, 4  ;;  %v687_v13 = vadd.f32 %v2886_v10, %v686_v48  ;;  %2517 = vmatpush3.bf16.msra.mxu1 %v2625_v30 }
 0x110   :  { %v689_v59 = vpop.f32.mrb[15].mxu0  ;;  %v2929_v60 = vpop.f32.mrb[15].mxu1  ;;  %v1314_v1 = vadd.f32 %v1313_v57, %v1312_v46  ;;  %v698_v15 = vadd.f32 %v2397_v54, %v2886_v10  ;;  %v1530_v19 = vrot.slane %v1529_v9, 4  ;;  %v1526_v23 = vadd.f32 %v1525_v0, %v1524_v26 }
 0x111   :  { %v2005_v40 = vsel %vm2004_vm0, %v1941_v44, %v1940_v50  ;;  %v1297_v61 = vadd.f32 %v1296_v51, %v1295_v39  ;;  %v1307_v7 = vadd.f32 %v1306_v62, %v1305_v52  ;;  %v1163_v25 = vmax.f32 %v695_v4, 0.0 }
 0x112   :  { %v1315_v12 = vrot.slane %v1314_v1, 2  ;;  %v1164_v27 = vmax.f32 %v698_v15, 0.0  ;;  %v1531_v33 = vadd.f32 %v1530_v19, %v1529_v9  ;;  %v690_v34 = vadd.f32 %v2886_v10, %v689_v59 }
 0x113   :  { %v1727_v5 = vmul.f32 0.0625, %v1297_v61  ;;  %v1308_v17 = vrot.slane %v1307_v7, 2  ;;  %v1304_v26 = vadd.f32 %v1303_v11, %v1302_v56  ;;  %v1519_v38 = vadd.f32 %v1518_v6, %v1517_v45 }
 0x114   :  { %v1316_v24 = vadd.f32 %v1315_v12, %v1314_v1  ;;  %v1326_v39 = vadd.f32 %v1164_v27, %v1163_v25  ;;  %v951_v41 = vadd.f32 %v2905_v3, %v2886_v10  ;;  %v1538_v46 = vadd.f32 %v1537_v18, %v1536_v2 }
 0x115   :  { %v1791_v16 = vpack.c.bf16 %v1727_v5, %v1727_v5  ;;  %v2935_v21 = vpop.f32.mrb[16].mxu0  ;;  %v2937_v22 = vpop.f32.mrb[16].mxu1  ;;  %v1309_v32 = vadd.f32 %v1308_v17, %v1307_v7  ;;  %v1161_v47 = vmax.f32 %v687_v13, 0.0  ;;  %v1162_v48 = vmax.f32 %v690_v34, 0.0 }
 0x116   :  { %v2939_v28 = vpop.f32.mrb[17].mxu0  ;;  %v2941_v29 = vpop.f32.mrb[17].mxu1  ;;  %v1317_v50 = vrot.slane %v1316_v24, 1  ;;  %v1327_v52 = vrot.slane %v1326_v39, 4  ;;  %v1527_v45 = vrot.slane %v1526_v23, 1  ;;  %v1532_v53 = vrot.slane %v1531_v33, 2 }
 0x117   :  { %v1942_v31 = vunpack.c.l.b16 %v1791_v16  ;;  %v2947_v35 = vpop.f32.mrb[18].mxu0  ;;  %v2949_v36 = vpop.f32.mrb[18].mxu1  ;;  %v1310_v51 = vrot.slane %v1309_v32, 1  ;;  %v1319_v54 = vadd.f32 %v1162_v48, %v1161_v47  ;;  %v943_v3 = vadd.f32 %v2886_v10, %v2907_v8 }
 0x118   :  { %v2953_v42 = vpop.f32.mrb[19].mxu0  ;;  %v2955_v43 = vpop.f32.mrb[19].mxu1  ;;  %v1520_v56 = vrot.slane %v1519_v38, 1  ;;  %v1328_v57 = vadd.f32 %v1327_v52, %v1326_v39  ;;  %v1227_v58 = vmax.f32 %v951_v41, 0.0  ;;  %v954_v59 = vadd.f32 %v2910_v14, %v2886_v10 }
 0x119   :  { %v2958_v44 = vsel %vm2006_vm1, %v1942_v31, %v2005_v40  ;;  %v1728_v40 = vmul.f32 0.0625, %v1304_v26  ;;  %v1539_v61 = vrot.slane %v1538_v46, 2  ;;  %v1320_v62 = vrot.slane %v1319_v54, 4 }
 0x11a   :  { %3619 = vst [vmem:[#allocation2_spill] sm:$0xff] %v2958_v44  ;;  %v1318_v1 = vadd.f32 %v1317_v50, %v1316_v24  ;;  %v1311_v2 = vadd.f32 %v1310_v51, %v1309_v32  ;;  %v1329_v4 = vrot.slane %v1328_v57, 2  ;;  %v1228_v5 = vmax.f32 %v954_v59, 0.0 }
 0x11b   :  { %v1533_v7 = vadd.f32 %v1532_v53, %v1531_v33  ;;  %v1321_v9 = vadd.f32 %v1320_v62, %v1319_v54  ;;  %v1225_v11 = vmax.f32 %v943_v3, 0.0  ;;  %v946_v14 = vadd.f32 %v2886_v10, %v2914_v20 }
 0x11c   :  { %v1528_v15 = vadd.f32 %v1527_v45, %v1526_v23  ;;  %v1521_v16 = vadd.f32 %v1520_v56, %v1519_v38  ;;  %v1330_v17 = vadd.f32 %v1329_v4, %v1328_v57  ;;  %v1550_v18 = vadd.f32 %v1228_v5, %v1227_v58 }
 0x11d   :  { %v2964_v63 = vpop.f32.mrb[20].mxu0  ;;  %v2966_v0 = vpop.f32.mrb[20].mxu1  ;;  %v1792_v25 = vpack.c.bf16 %v1728_v40, %v1728_v40  ;;  %v2982_v27 = vadd.f32 %v1539_v61, %v1538_v46  ;;  %v1322_v30 = vrot.slane %v1321_v9, 2  ;;  %v1226_v31 = vmax.f32 %v946_v14, 0.0 }
 0x11e   :  { %v2968_v6 = vpop.f32.mrb[21].mxu0  ;;  %v2970_v8 = vpop.f32.mrb[21].mxu1  ;;  %v1730_v32 = vmul.f32 0.0625, %v1318_v1  ;;  %v1729_v33 = vmul.f32 0.0625, %v1311_v2  ;;  %v1534_v20 = vrot.slane %v1533_v7, 1  ;;  %v967_v23 = vadd.f32 %v2922_v37, %v2886_v10 }
 0x11f   :  { %v2974_v12 = vpop.f32.mrb[22].mxu0  ;;  %v2976_v13 = vpop.f32.mrb[22].mxu1  ;;  %3620 = vst [vmem:[#allocation3_spill] sm:$0xff] %v2982_v27  ;;  %v1323_v34 = vadd.f32 %v1322_v30, %v1321_v9  ;;  %v1543_v26 = vadd.f32 %v1226_v31, %v1225_v11  ;;  %v2986_v38 = vmul.f32 0.0625, %v1528_v15  ;;  %v1331_v39 = vrot.slane %v1330_v17, 1 }
 0x120   :  { %v2978_v19 = vpop.f32.mrb[23].mxu0  ;;  %v2980_v24 = vpop.f32.mrb[23].mxu1  ;;  %v1551_v41 = vrot.slane %v1550_v18, 4  ;;  %v711_v47 = vadd.f32 %v2935_v21, %v2886_v10  ;;  %v2990_v48 = vunpack.c.l.b16 %v1792_v25  ;;  %v2992_v46 = vmul.f32 0.0625, %v1521_v16 }
 0x121   :  { %3621 = vst [vmem:[#allocation4_spill] sm:$0xff] %v2986_v38  ;;  %v1324_v51 = vrot.slane %v1323_v34, 1  ;;  %v1794_v53 = vpack.c.bf16 %v1730_v32, %v1730_v32  ;;  %v1793_v37 = vpack.c.bf16 %v1729_v33, %v1729_v33  ;;  %v703_v54 = vadd.f32 %v2886_v10, %v2939_v28 }
 0x122   :  { %3622 = vst [vmem:[#allocation5_spill] sm:$0xff] %v2990_v48  ;;  %3623 = vst [vmem:[#allocation6_spill] sm:$0xff] %v2992_v46  ;;  %v959_v3 = vadd.f32 %v2886_v10, %v2925_v49  ;;  %v3007_v57 = vadd.f32 %v1534_v20, %v1533_v7  ;;  %v1231_v58 = vmax.f32 %v967_v23, 0.0  ;;  %v714_v59 = vadd.f32 %v2947_v35, %v2886_v10 }
 0x123   :  { %v970_v40 = vadd.f32 %v2927_v55, %v2886_v10  ;;  %v1332_v28 = vadd.f32 %v1331_v39, %v1330_v17  ;;  %v1552_v1 = vadd.f32 %v1551_v41, %v1550_v18  ;;  %v1167_v49 = vmax.f32 %v711_v47, 0.0 }
 0x124   :  { %3624 = vst [vmem:[#allocation7_spill] sm:$0xff] %v3007_v57  ;;  %v706_v2 = vadd.f32 %v2886_v10, %v2953_v42  ;;  %v1325_v7 = vadd.f32 %v1324_v51, %v1323_v34  ;;  %v1544_v9 = vrot.slane %v1543_v26, 4  ;;  %v1168_v35 = vmax.f32 %v714_v59, 0.0 }
 0x125   :  { %v2995_v52 = vpop.f32.mrb[24].mxu0  ;;  %v2997_v45 = vpop.f32.mrb[24].mxu1  ;;  %v1232_v11 = vmax.f32 %v970_v40, 0.0  ;;  %v1165_v14 = vmax.f32 %v703_v54, 0.0  ;;  %v1229_v55 = vmax.f32 %v959_v3, 0.0  ;;  %v962_v16 = vadd.f32 %v2886_v10, %v2929_v60 }
 0x126   :  { %v3003_v21 = vpop.f32.mrb[25].mxu0  ;;  %v3005_v56 = vpop.f32.mrb[25].mxu1  ;;  %v1166_v15 = vmax.f32 %v706_v2, 0.0  ;;  %v3025_v17 = vunpack.c.l.b16 %v1794_v53  ;;  %v1340_v18 = vadd.f32 %v1168_v35, %v1167_v49  ;;  %v983_v42 = vadd.f32 %v2937_v22, %v2886_v10  ;;  %v2626_v49 = vld [vmem:[%s3610_s3 + $0x20] sm:$0xff]  }
 0x127   :  { %v3013_v61 = vpop.f32.mrb[26].mxu0  ;;  %v3015_v62 = vpop.f32.mrb[26].mxu1  ;;  %v1564_v25 = vadd.f32 %v1232_v11, %v1231_v58  ;;  %v3029_v30 = vunpack.c.l.b16 %v1793_v37  ;;  %v3031_v31 = vmul.f32 0.0625, %v1332_v28  ;;  %v1230_v33 = vmax.f32 %v962_v16, 0.0  ;;  %2518 = vmatprep.subr.bf16.mxu1 %v2626_v49 }
 0x128   :  { %v3019_v4 = vpop.f32.mrb[27].mxu0  ;;  %v3021_v5 = vpop.f32.mrb[27].mxu1  ;;  %3625 = vst [vmem:[#allocation8_spill] sm:$0xff] %v3025_v17  ;;  %v1333_v32 = vadd.f32 %v1166_v15, %v1165_v14  ;;  %v1553_v20 = vrot.slane %v1552_v1, 2  ;;  %v1545_v34 = vadd.f32 %v1544_v9, %v1543_v26  ;;  %v1341_v23 = vrot.slane %v1340_v18, 4  ;;  %2519 = vmatpush3.bf16.msra.mxu1 %v2626_v49 }
 0x129   :  { %3626 = vst [vmem:[#allocation9_spill] sm:$0xff] %v3029_v30  ;;  %3627 = vst [vmem:[#allocation10_spill] sm:$0xff] %v3031_v31  ;;  %v1565_v39 = vrot.slane %v1564_v25, 4  ;;  %v3037_v47 = vmul.f32 0.0625, %v1325_v7  ;;  %v1557_v53 = vadd.f32 %v1230_v33, %v1229_v55  ;;  %v975_v22 = vadd.f32 %v2886_v10, %v2941_v29 }
 0x12a   :  { %v1334_v51 = vrot.slane %v1333_v32, 4  ;;  %v1342_v3 = vadd.f32 %v1341_v23, %v1340_v18  ;;  %v1235_v26 = vmax.f32 %v983_v42, 0.0  ;;  %v986_v59 = vadd.f32 %v2949_v36, %v2886_v10 }
 0x12b   :  { %v1566_v58 = vadd.f32 %v1565_v39, %v1564_v25  ;;  %v1558_v29 = vrot.slane %v1557_v53, 4  ;;  %v1233_v7 = vmax.f32 %v975_v22, 0.0  ;;  %v978_v9 = vadd.f32 %v2886_v10, %v2955_v43 }
 0x12c   :  { %v1335_v2 = vadd.f32 %v1334_v51, %v1333_v32  ;;  %v1546_v14 = vrot.slane %v1545_v34, 2  ;;  %v1343_v36 = vrot.slane %v1342_v3, 2  ;;  %v1236_v15 = vmax.f32 %v986_v59, 0.0 }
 0x12d   :  { %v3033_v41 = vpop.f32.mrb[28].mxu0  ;;  %v3035_v60 = vpop.f32.mrb[28].mxu1  ;;  %v1567_v55 = vrot.slane %v1566_v58, 2  ;;  %v3060_v16 = vadd.f32 %v1553_v20, %v1552_v1  ;;  %v1559_v25 = vadd.f32 %v1558_v29, %v1557_v53  ;;  %v1234_v42 = vmax.f32 %v978_v9, 0.0 }
 0x12e   :  { %v3041_v37 = vpop.f32.mrb[29].mxu0  ;;  %v3043_v54 = vpop.f32.mrb[29].mxu1  ;;  %v1336_v18 = vrot.slane %v1335_v2, 2  ;;  %v1344_v32 = vadd.f32 %v1343_v36, %v1342_v3  ;;  %v1578_v23 = vadd.f32 %v1236_v15, %v1235_v26  ;;  %v727_v43 = vadd.f32 %v2964_v63, %v2886_v10 }
 0x12f   :  { %v3047_v40 = vpop.f32.mrb[30].mxu0  ;;  %v3049_v28 = vpop.f32.mrb[30].mxu1  ;;  %3628 = vst [vmem:[#allocation11_spill] sm:$0xff] %v3060_v16  ;;  %v1568_v33 = vadd.f32 %v1567_v55, %v1566_v58  ;;  %v1560_v22 = vrot.slane %v1559_v25, 2  ;;  %v1571_v50 = vadd.f32 %v1234_v42, %v1233_v7  ;;  %v3066_v59 = vadd.f32 %v1546_v14, %v1545_v34 }
 0x130   :  { %v3056_v35 = vpop.f32.mrb[31].mxu0  ;;  %v3058_v11 = vpop.f32.mrb[31].mxu1  ;;  %v1337_v51 = vadd.f32 %v1336_v18, %v1335_v2  ;;  %v1345_v1 = vrot.slane %v1344_v32, 1  ;;  %v1579_v46 = vrot.slane %v1578_v23, 4  ;;  %v999_v63 = vadd.f32 %v2966_v0, %v2886_v10 }
 0x131   :  { %3629 = vst [vmem:[#allocation12_spill] sm:$0xff] %v3066_v59  ;;  %v1569_v20 = vrot.slane %v1568_v33, 1  ;;  %v1561_v58 = vadd.f32 %v1560_v22, %v1559_v25  ;;  %v1572_v26 = vrot.slane %v1571_v50, 4  ;;  %v1171_v14 = vmax.f32 %v727_v43, 0.0 }
 0x132   :  { %v1338_v3 = vrot.slane %v1337_v51, 1  ;;  %v1346_v7 = vadd.f32 %v1345_v1, %v1344_v32  ;;  %v1580_v9 = vadd.f32 %v1579_v46, %v1578_v23  ;;  %v719_v25 = vadd.f32 %v2886_v10, %v2968_v6 }
 0x133   :  { %v1570_v34 = vadd.f32 %v1569_v20, %v1568_v33  ;;  %v1562_v18 = vrot.slane %v1561_v58, 1  ;;  %v1573_v42 = vadd.f32 %v1572_v26, %v1571_v50  ;;  %v1239_v33 = vmax.f32 %v999_v63, 0.0 }
 0x134   :  { %v1339_v15 = vadd.f32 %v1338_v3, %v1337_v51  ;;  %v1734_v39 = vmul.f32 0.0625, %v1346_v7  ;;  %v1581_v32 = vrot.slane %v1580_v9, 2  ;;  %v991_v1 = vadd.f32 %v2886_v10, %v2970_v8 }
 0x135   :  { %v3068_v53 = vpop.f32.mrb[32].mxu0  ;;  %v3070_v49 = vpop.f32.mrb[32].mxu1  ;;  %v1766_v38 = vmul.f32 0.0625, %v1570_v34  ;;  %v1563_v23 = vadd.f32 %v1562_v18, %v1561_v58  ;;  %v1574_v43 = vrot.slane %v1573_v42, 2  ;;  %v730_v6 = vadd.f32 %v2974_v12, %v2886_v10 }
 0x136   :  { %v3074_v29 = vpop.f32.mrb[33].mxu0  ;;  %v3076_v2 = vpop.f32.mrb[33].mxu1  ;;  %v1733_v46 = vmul.f32 0.0625, %v1339_v15  ;;  %v1798_v51 = vpack.c.bf16 %v1734_v39, %v1734_v39  ;;  %v1582_v50 = vadd.f32 %v1581_v32, %v1580_v9  ;;  %v1237_v27 = vmax.f32 %v991_v1, 0.0 }
 0x137   :  { %v3078_v36 = vpop.f32.mrb[34].mxu0  ;;  %v3080_v55 = vpop.f32.mrb[34].mxu1  ;;  %v1830_v20 = vpack.c.bf16 %v1766_v38, %v1766_v38  ;;  %v1765_v26 = vmul.f32 0.0625, %v1563_v23  ;;  %v1575_v57 = vadd.f32 %v1574_v43, %v1573_v42  ;;  %v1172_v63 = vmax.f32 %v730_v6, 0.0 }
 0x138   :  { %v3084_v22 = vpop.f32.mrb[35].mxu0  ;;  %v3086_v0 = vpop.f32.mrb[35].mxu1  ;;  %v1797_v3 = vpack.c.bf16 %v1733_v46, %v1733_v46  ;;  %v1949_v7 = vunpack.c.l.b16 %v1798_v51  ;;  %v1583_v16 = vrot.slane %v1582_v50, 1  ;;  %v1002_v38 = vadd.f32 %v2976_v13, %v2886_v10 }
 0x139   :  { %v1981_v34 = vunpack.c.l.b16 %v1830_v20  ;;  %v1829_v8 = vpack.c.bf16 %v1765_v26, %v1765_v26  ;;  %v1576_v39 = vrot.slane %v1575_v57, 1  ;;  %v1354_v32 = vadd.f32 %v1172_v63, %v1171_v14 }
 0x13a   :  { %v1948_v18 = vunpack.c.l.b16 %v1797_v3  ;;  %v1584_v42 = vadd.f32 %v1583_v16, %v1582_v50  ;;  %v722_v46 = vadd.f32 %v2886_v10, %v2978_v19  ;;  %v994_v23 = vadd.f32 %v2886_v10, %v2980_v24 }
 0x13b   :  { %v1980_v13 = vunpack.c.l.b16 %v1829_v8  ;;  %v1577_v20 = vadd.f32 %v1576_v39, %v1575_v57  ;;  %v1240_v6 = vmax.f32 %v1002_v38, 0.0  ;;  %v1169_v14 = vmax.f32 %v719_v25, 0.0 }
 0x13c   :  { %v3111_v51 = vsel %vm2004_vm0, %v1949_v7, %v1948_v18  ;;  %v1355_v50 = vrot.slane %v1354_v32, 4  ;;  %v1170_v19 = vmax.f32 %v722_v46, 0.0  ;;  %v1238_v26 = vmax.f32 %v994_v23, 0.0 }
 0x13d   :  { %v3092_v15 = vpop.f32.mrb[36].mxu0  ;;  %v3094_v58 = vpop.f32.mrb[36].mxu1  ;;  %v2046_v24 = vsel %vm2004_vm0, %v1981_v34, %v1980_v13  ;;  %v1767_v63 = vmul.f32 0.0625, %v1577_v20  ;;  %v1592_v17 = vadd.f32 %v1240_v6, %v1239_v33  ;;  %v743_v30 = vadd.f32 %v2995_v52, %v2886_v10 }
 0x13e   :  { %v3098_v9 = vpop.f32.mrb[37].mxu0  ;;  %v3100_v12 = vpop.f32.mrb[37].mxu1  ;;  %v3630_v7 = vpack.c.bf16 %v3037_v47, %v3037_v47  ;;  %v1356_v18 = vadd.f32 %v1355_v50, %v1354_v32  ;;  %v1347_v8 = vadd.f32 %v1170_v19, %v1169_v14  ;;  %v1585_v39 = vadd.f32 %v1238_v26, %v1237_v27 }
 0x13f   :  { %v3106_v43 = vpop.f32.mrb[38].mxu0  ;;  %v3108_v1 = vpop.f32.mrb[38].mxu1  ;;  %v3125_v38 = vmul.f32 0.0625, %v1584_v42  ;;  %v1831_v25 = vpack.c.bf16 %v1767_v63, %v1767_v63  ;;  %v1593_v46 = vrot.slane %v1592_v17, 4  ;;  %v1015_v34 = vadd.f32 %v2997_v45, %v2886_v10 }
 0x140   :  { %v3113_v3 = vpop.f32.mrb[39].mxu0  ;;  %v3115_v16 = vpop.f32.mrb[39].mxu1  ;;  %v3123_v57 = vunpack.c.l.b16 %v3630_v7  ;;  %v1357_v23 = vrot.slane %v1356_v18, 2  ;;  %v1348_v33 = vrot.slane %v1347_v8, 4  ;;  %v1586_v13 = vrot.slane %v1585_v39, 4 }
 0x141   :  { %v1175_v20 = vmax.f32 %v743_v30, 0.0  ;;  %v1982_v47 = vunpack.c.l.b16 %v1831_v25  ;;  %v1594_v7 = vadd.f32 %v1593_v46, %v1592_v17  ;;  %v1243_v32 = vmax.f32 %v1015_v34, 0.0 }
 0x142   :  { %3631 = vst [vmem:[#allocation13_spill] sm:$0xff] %v3123_v57  ;;  %v735_v27 = vadd.f32 %v2886_v10, %v3003_v21  ;;  %v1358_v50 = vadd.f32 %v1357_v23, %v1356_v18  ;;  %v1349_v45 = vadd.f32 %v1348_v33, %v1347_v8  ;;  %v1587_v19 = vadd.f32 %v1586_v13, %v1585_v39 }
 0x143   :  { %v1007_v30 = vadd.f32 %v2886_v10, %v3005_v56  ;;  %v3146_v17 = vsel %vm2006_vm1, %v1982_v47, %v2046_v24  ;;  %v1595_v25 = vrot.slane %v1594_v7, 2  ;;  %v746_v21 = vadd.f32 %v3013_v61, %v2886_v10 }
 0x144   :  { %3632 = vst [vmem:[#allocation14_spill] sm:$0xff] %v3146_v17  ;;  %v1173_v46 = vmax.f32 %v735_v27, 0.0  ;;  %v1359_v8 = vrot.slane %v1358_v50, 1  ;;  %v1350_v39 = vrot.slane %v1349_v45, 2  ;;  %v1588_v23 = vrot.slane %v1587_v19, 2 }
 0x145   :  { %v3129_v52 = vpop.f32.mrb[40].mxu0  ;;  %v3131_v6 = vpop.f32.mrb[40].mxu1  ;;  %v1241_v56 = vmax.f32 %v1007_v30, 0.0  ;;  %v1596_v33 = vadd.f32 %v1595_v25, %v1594_v7  ;;  %v1176_v13 = vmax.f32 %v746_v21, 0.0  ;;  %v1018_v57 = vadd.f32 %v3015_v62, %v2886_v10 }
 0x146   :  { %v3135_v42 = vpop.f32.mrb[41].mxu0  ;;  %v3137_v14 = vpop.f32.mrb[41].mxu1  ;;  %v738_v24 = vadd.f32 %v2886_v10, %v3019_v4  ;;  %v1360_v47 = vadd.f32 %v1359_v8, %v1358_v50  ;;  %v1351_v27 = vadd.f32 %v1350_v39, %v1349_v45  ;;  %v1589_v17 = vadd.f32 %v1588_v23, %v1587_v19 }
 0x147   :  { %v3141_v26 = vpop.f32.mrb[42].mxu0  ;;  %v3143_v63 = vpop.f32.mrb[42].mxu1  ;;  %v1010_v61 = vadd.f32 %v2886_v10, %v3021_v5  ;;  %v1597_v48 = vrot.slane %v1596_v33, 1  ;;  %v1368_v44 = vadd.f32 %v1176_v13, %v1175_v20  ;;  %v1244_v31 = vmax.f32 %v1018_v57, 0.0  ;;  %v2627_v57 = vld [vmem:[%s3610_s3 + $0x28] sm:$0xff]  }
 0x148   :  { %v3150_v34 = vpop.f32.mrb[43].mxu0  ;;  %v3152_v18 = vpop.f32.mrb[43].mxu1  ;;  %v1832_v7 = vpack.c.bf16 %v3125_v38, %v3125_v38  ;;  %v1352_v30 = vrot.slane %v1351_v27, 1  ;;  %v1590_v25 = vrot.slane %v1589_v17, 1  ;;  %v1736_v38 = vmul.f32 0.0625, %v1360_v47  ;;  %2520 = vmatprep.subr.bf16.mxu1 %v2627_v57 }
 0x149   :  { %3633 = vst [vmem:[#allocation15_spill] sm:$0xff] %v3150_v34  ;;  %3634 = vst [vmem:[#allocation16_spill] sm:$0xff] %v3152_v18  ;;  %v1174_v18 = vmax.f32 %v738_v24, 0.0  ;;  %v1242_v21 = vmax.f32 %v1010_v61, 0.0  ;;  %v1598_v4 = vadd.f32 %v1597_v48, %v1596_v33  ;;  %v1369_v50 = vrot.slane %v1368_v44, 4  ;;  %2521 = vmatpush3.bf16.msra.mxu1 %v2627_v57 }
 0x14a   :  { %v1606_v45 = vadd.f32 %v1244_v31, %v1243_v32  ;;  %v1353_v20 = vadd.f32 %v1352_v30, %v1351_v27  ;;  %v1591_v39 = vadd.f32 %v1590_v25, %v1589_v17  ;;  %v3182_v17 = vunpack.c.l.b16 %v1832_v7 }
 0x14b   :  { %v1361_v19 = vadd.f32 %v1174_v18, %v1173_v46  ;;  %v1599_v23 = vadd.f32 %v1242_v21, %v1241_v56  ;;  %v1770_v48 = vmul.f32 0.0625, %v1598_v4  ;;  %v1370_v33 = vadd.f32 %v1369_v50, %v1368_v44 }
 0x14c   :  { %v1607_v31 = vrot.slane %v1606_v45, 4  ;;  %v1769_v47 = vmul.f32 0.0625, %v1591_v39  ;;  %3640 = vst [vmem:[#allocation22_spill] sm:$0xff] %v3182_v17  ;;  %v1800_v21 = vpack.c.bf16 %v1736_v38, %v1736_v38  ;;  %v759_v50 = vadd.f32 %v3033_v41, %v2886_v10 }
 0x14d   :  { %v3162_v62 = vpop.f32.mrb[44].mxu0  ;;  %v3164_v34 = vpop.f32.mrb[44].mxu1  ;;  %v1362_v32 = vrot.slane %v1361_v19, 4  ;;  %v1600_v27 = vrot.slane %v1599_v23, 4  ;;  %v1371_v56 = vrot.slane %v1370_v33, 2 }
 0x14e   :  { %3635 = vst [vmem:[#allocation17_spill] sm:$0xff] %v3164_v34  ;;  %v3166_v8 = vpop.f32.mrb[45].mxu0  ;;  %v3168_v5 = vpop.f32.mrb[45].mxu1  ;;  %v1608_v30 = vadd.f32 %v1607_v31, %v1606_v45  ;;  %v1179_v59 = vmax.f32 %v759_v50, 0.0  ;;  %v762_v31 = vadd.f32 %v3047_v40, %v2886_v10  ;;  %v775_v40 = vadd.f32 %v3068_v53, %v2886_v10 }
 0x14f   :  { %3636 = vst [vmem:[#allocation18_spill] sm:$0xff] %v3168_v5  ;;  %v3173_v13 = vpop.f32.mrb[46].mxu0  ;;  %v3175_v24 = vpop.f32.mrb[46].mxu1  ;;  %v1735_v5 = vmul.f32 0.0625, %v1353_v20  ;;  %v1363_v25 = vadd.f32 %v1362_v32, %v1361_v19  ;;  %v1601_v4 = vadd.f32 %v1600_v27, %v1599_v23  ;;  %v1833_v20 = vpack.c.bf16 %v1769_v47, %v1769_v47 }
 0x150   :  { %3637 = vst [vmem:[#allocation19_spill] sm:$0xff] %v3175_v24  ;;  %v3177_v46 = vpop.f32.mrb[47].mxu0  ;;  %v3179_v18 = vpop.f32.mrb[47].mxu1  ;;  %v1834_v24 = vpack.c.bf16 %v1770_v48, %v1770_v48  ;;  %v1609_v34 = vrot.slane %v1608_v30, 2  ;;  %v754_v32 = vadd.f32 %v2886_v10, %v3056_v35 }
 0x151   :  { %3638 = vst [vmem:[#allocation20_spill] sm:$0xff] %v3177_v46  ;;  %3639 = vst [vmem:[#allocation21_spill] sm:$0xff] %v3179_v18  ;;  %v1799_v44 = vpack.c.bf16 %v1735_v5, %v1735_v5  ;;  %v1372_v18 = vadd.f32 %v1371_v56, %v1370_v33  ;;  %v1364_v46 = vrot.slane %v1363_v25, 2  ;;  %v1602_v39 = vrot.slane %v1601_v4, 2 }
 0x152   :  { %v1610_v19 = vadd.f32 %v1609_v34, %v1608_v30  ;;  %v751_v5 = vadd.f32 %v2886_v10, %v3041_v37 }
 0x153   :  { %v1950_v61 = vunpack.c.l.b16 %v1799_v44  ;;  %v1373_v45 = vrot.slane %v1372_v18, 1  ;;  %v1365_v38 = vadd.f32 %v1364_v46, %v1363_v25  ;;  %v1603_v33 = vadd.f32 %v1602_v39, %v1601_v4 }
 0x154   :  { %v1611_v47 = vrot.slane %v1610_v19, 1  ;;  %v1177_v56 = vmax.f32 %v751_v5, 0.0  ;;  %v1178_v44 = vmax.f32 %v754_v32, 0.0  ;;  %v1031_v39 = vadd.f32 %v3035_v60, %v2886_v10 }
 0x155   :  { %v3186_v57 = vpop.f32.mrb[48].mxu0  ;;  %v3188_v7 = vpop.f32.mrb[48].mxu1  ;;  %v3198_v48 = vsel %vm2006_vm1, %v1950_v61, %v3111_v51  ;;  %v1374_v37 = vadd.f32 %v1373_v45, %v1372_v18  ;;  %v1366_v27 = vrot.slane %v1365_v38, 1  ;;  %v1604_v51 = vrot.slane %v1603_v33, 1 }
 0x156   :  { %v3192_v23 = vpop.f32.mrb[49].mxu0  ;;  %v3194_v41 = vpop.f32.mrb[49].mxu1  ;;  %v1180_v61 = vmax.f32 %v762_v31, 0.0  ;;  %v1612_v35 = vadd.f32 %v1611_v47, %v1610_v19  ;;  %v3216_v18 = vunpack.c.l.b16 %v1800_v21  ;;  %v1375_v17 = vadd.f32 %v1178_v44, %v1177_v56 }
 0x157   :  { %3641 = vst [vmem:[#allocation23_spill] sm:$0xff] %v3194_v41  ;;  %v3204_v34 = vpop.f32.mrb[50].mxu0  ;;  %v3206_v46 = vpop.f32.mrb[50].mxu1  ;;  %v1738_v4 = vmul.f32 0.0625, %v1374_v37  ;;  %v1367_v50 = vadd.f32 %v1366_v27, %v1365_v38  ;;  %v1605_v45 = vadd.f32 %v1604_v51, %v1603_v33  ;;  %v1183_v37 = vmax.f32 %v775_v40, 0.0 }
 0x158   :  { %3642 = vst [vmem:[#allocation24_spill] sm:$0xff] %v3206_v46  ;;  %v3208_v30 = vpop.f32.mrb[51].mxu0  ;;  %v3210_v25 = vpop.f32.mrb[51].mxu1  ;;  %v1382_v5 = vadd.f32 %v1180_v61, %v1179_v59  ;;  %v3218_v46 = vunpack.c.l.b16 %v1834_v24  ;;  %v1376_v53 = vrot.slane %v1375_v17, 4  ;;  %v767_v19 = vadd.f32 %v2886_v10, %v3074_v29 }
 0x159   :  { %3643 = vst [vmem:[#allocation25_spill] sm:$0xff] %v3210_v25  ;;  %v3220_v25 = vunpack.c.l.b16 %v1833_v20  ;;  %v1802_v31 = vpack.c.bf16 %v1738_v4, %v1738_v4  ;;  %v3222_v32 = vmul.f32 0.0625, %v1367_v50  ;;  %v3230_v21 = vmul.f32 0.0625, %v1612_v35 }
 0x15a   :  { %3644 = vst [vmem:[#allocation26_spill] sm:$0xff] %v3218_v46  ;;  %v1383_v41 = vrot.slane %v1382_v5, 4  ;;  %v1247_v59 = vmax.f32 %v1031_v39, 0.0  ;;  %v1023_v24 = vadd.f32 %v2886_v10, %v3043_v54  ;;  %v778_v20 = vadd.f32 %v3078_v36, %v2886_v10  ;;  %v3251_v10 = vld [vmem:[%s3611_s2] ss:$0 sm:$0xff] }
 0x15b   :  { %3645 = vst [vmem:[#allocation27_spill] sm:$0xff] %v3220_v25  ;;  %3646 = vst [vmem:[#allocation28_spill] sm:$0xff] %v3230_v21  ;;  %v3240_v27 = vunpack.c.l.b16 %v1802_v31  ;;  %v1771_v29 = vmul.f32 0.0625, %v1605_v45  ;;  %v1377_v51 = vadd.f32 %v1376_v53, %v1375_v17  ;;  %v1801_v40 = vpack.c.bf16 %v3222_v32, %v3222_v32 }
 0x15c   :  { %v1384_v56 = vadd.f32 %v1383_v41, %v1382_v5  ;;  %v1181_v54 = vmax.f32 %v767_v19, 0.0  ;;  %v1184_v4 = vmax.f32 %v778_v20, 0.0  ;;  %v1034_v36 = vadd.f32 %v3251_v10, %v3049_v28 }
 0x15d   :  { %v3226_v38 = vpop.f32.mrb[52].mxu0  ;;  %v3228_v60 = vpop.f32.mrb[52].mxu1  ;;  %v1378_v50 = vrot.slane %v1377_v51, 2  ;;  %v1245_v39 = vmax.f32 %v1023_v24, 0.0  ;;  %v770_v45 = vadd.f32 %v3251_v10, %v3084_v22  ;;  %v1026_v32 = vadd.f32 %v3251_v10, %v3058_v11 }
 0x15e   :  { %v3236_v33 = vpop.f32.mrb[53].mxu0  ;;  %v3238_v47 = vpop.f32.mrb[53].mxu1  ;;  %v1385_v41 = vrot.slane %v1384_v56, 2  ;;  %v1396_v5 = vadd.f32 %v1184_v4, %v1183_v37  ;;  %v1248_v31 = vmax.f32 %v1034_v36, 0.0  ;;  %v1047_v53 = vadd.f32 %v3251_v10, %v3070_v49 }
 0x15f   :  { %v3242_v61 = vpop.f32.mrb[54].mxu0  ;;  %v3244_v44 = vpop.f32.mrb[54].mxu1  ;;  %v1379_v28 = vadd.f32 %v1378_v50, %v1377_v51  ;;  %v1182_v20 = vmax.f32 %v770_v45, 0.0  ;;  %v1039_v46 = vadd.f32 %v3251_v10, %v3076_v2  ;;  %v1835_v25 = vpack.c.bf16 %v1771_v29, %v1771_v29 }
 0x160   :  { %3647 = vst [vmem:[#allocation29_spill] sm:$0xff] %v3244_v44  ;;  %v3255_v35 = vpop.f32.mrb[55].mxu0  ;;  %v3257_v17 = vpop.f32.mrb[55].mxu1  ;;  %v1386_v19 = vadd.f32 %v1385_v41, %v1384_v56  ;;  %v1397_v21 = vrot.slane %v1396_v5, 4  ;;  %v1620_v24 = vadd.f32 %v1248_v31, %v1247_v59  ;;  %v1251_v4 = vmax.f32 %v1047_v53, 0.0 }
 0x161   :  { %3648 = vst [vmem:[#allocation30_spill] sm:$0xff] %v3255_v35  ;;  %3649 = vst [vmem:[#allocation31_spill] sm:$0xff] %v3257_v17  ;;  %v1246_v17 = vmax.f32 %v1026_v32, 0.0  ;;  %v1380_v22 = vrot.slane %v1379_v28, 1  ;;  %v1389_v37 = vadd.f32 %v1182_v20, %v1181_v54  ;;  %v1050_v51 = vadd.f32 %v3251_v10, %v3080_v55 }
 0x162   :  { %v1387_v35 = vrot.slane %v1386_v19, 1  ;;  %v1398_v44 = vadd.f32 %v1397_v21, %v1396_v5  ;;  %v1621_v49 = vrot.slane %v1620_v24, 4  ;;  %v1249_v50 = vmax.f32 %v1039_v46, 0.0 }
 0x163   :  { %v1613_v56 = vadd.f32 %v1246_v17, %v1245_v39  ;;  %v1390_v29 = vrot.slane %v1389_v37, 4  ;;  %v1042_v54 = vadd.f32 %v3251_v10, %v3086_v0  ;;  %v1252_v39 = vmax.f32 %v1050_v51, 0.0 }
 0x164   :  { %v1388_v59 = vadd.f32 %v1387_v35, %v1386_v19  ;;  %v1399_v21 = vrot.slane %v1398_v44, 2  ;;  %v1622_v5 = vadd.f32 %v1621_v49, %v1620_v24  ;;  %v2628_v35 = vld [vmem:[%s3610_s3 + $0x30] sm:$0xff]   ;;  %v3290_v46 = vunpack.c.l.b16 %v1801_v40 }
 0x165   :  { %v3267_v36 = vpop.f32.mrb[56].mxu0  ;;  %v3269_v11 = vpop.f32.mrb[56].mxu1  ;;  %v1614_v17 = vrot.slane %v1613_v56, 4  ;;  %v1381_v53 = vadd.f32 %v1380_v22, %v1379_v28  ;;  %v1391_v0 = vadd.f32 %v1390_v29, %v1389_v37  ;;  %v1250_v19 = vmax.f32 %v1042_v54, 0.0  ;;  %2522 = vmatprep.subr.bf16.mxu1 %v2628_v35 }
 0x166   :  { %3650 = vst [vmem:[#allocation32_spill] sm:$0xff] %v3267_v36  ;;  %3651 = vst [vmem:[#allocation33_spill] sm:$0xff] %v3269_v11  ;;  %v3273_v41 = vpop.f32.mrb[57].mxu0  ;;  %v3275_v2 = vpop.f32.mrb[57].mxu1  ;;  %v1400_v20 = vadd.f32 %v1399_v21, %v1398_v44  ;;  %v3292_v24 = vunpack.c.l.b16 %v1835_v25  ;;  %v3294_v49 = vmul.f32 0.0625, %v1388_v59  ;;  %2523 = vmatpush3.bf16.msra.mxu1 %v2628_v35  ;;  %v791_v44 = vadd.f32 %v3251_v10, %v3092_v15  ;;  %v2629_v25 = vld [vmem:[%s3610_s3 + $0x38] sm:$0xff]  }
 0x167   :  { %3652 = vst [vmem:[#allocation34_spill] sm:$0xff] %v3273_v41  ;;  %3653 = vst [vmem:[#allocation35_spill] sm:$0xff] %v3275_v2  ;;  %v3279_v45 = vpop.f32.mrb[58].mxu0  ;;  %v3281_v31 = vpop.f32.mrb[58].mxu1  ;;  %v1634_v2 = vadd.f32 %v1252_v39, %v1251_v4  ;;  %v1392_v51 = vrot.slane %v1391_v0, 2  ;;  %v3296_v36 = vmul.f32 0.0625, %v1381_v53  ;;  %v1063_v21 = vadd.f32 %v3251_v10, %v3094_v58  ;;  %2524 = vmatprep.subr.bf16.mxu1 %v2629_v25 }
 0x168   :  { %3654 = vst [vmem:[#allocation36_spill] sm:$0xff] %v3279_v45  ;;  %3655 = vst [vmem:[#allocation37_spill] sm:$0xff] %v3281_v31  ;;  %v3283_v32 = vpop.f32.mrb[59].mxu0  ;;  %v3285_v55 = vpop.f32.mrb[59].mxu1  ;;  %v1623_v45 = vrot.slane %v1622_v5, 2  ;;  %v1615_v31 = vadd.f32 %v1614_v17, %v1613_v56  ;;  %v783_v15 = vadd.f32 %v3251_v10, %v3098_v9 }
 0x169   :  { %3656 = vst [vmem:[#allocation38_spill] sm:$0xff] %v3283_v32  ;;  %3657 = vst [vmem:[#allocation39_spill] sm:$0xff] %v3285_v55  ;;  %v1627_v55 = vadd.f32 %v1250_v19, %v1249_v50  ;;  %v1401_v32 = vrot.slane %v1400_v20, 1  ;;  %v1635_v40 = vrot.slane %v1634_v2, 4  ;;  %v1393_v28 = vadd.f32 %v1392_v51, %v1391_v0 }
 0x16a   :  { %v1624_v41 = vadd.f32 %v1623_v45, %v1622_v5  ;;  %v1616_v11 = vrot.slane %v1615_v31, 2  ;;  %2525 = vmatpush3.bf16.msra.mxu1 %v2629_v25  ;;  %v1185_v25 = vmax.f32 %v783_v15, 0.0  ;;  %v786_v15 = vadd.f32 %v3251_v10, %v3113_v3 }
 0x16b   :  { %v1628_v22 = vrot.slane %v1627_v55, 4  ;;  %v1402_v4 = vadd.f32 %v1401_v32, %v1400_v20  ;;  %v1636_v29 = vadd.f32 %v1635_v40, %v1634_v2  ;;  %v1394_v54 = vrot.slane %v1393_v28, 1 }
 0x16c   :  { %v1625_v56 = vrot.slane %v1624_v41, 1  ;;  %v1617_v59 = vadd.f32 %v1616_v11, %v1615_v31  ;;  %v1187_v31 = vmax.f32 %v791_v44, 0.0  ;;  %v1055_v40 = vadd.f32 %v3251_v10, %v3100_v12 }
 0x16d   :  { %v3300_v37 = vpop.f32.mrb[60].mxu0  ;;  %v1629_v45 = vadd.f32 %v1628_v22, %v1627_v55  ;;  %v1742_v17 = vmul.f32 0.0625, %v1402_v4  ;;  %v1637_v32 = vrot.slane %v1636_v29, 2  ;;  %v1395_v11 = vadd.f32 %v1394_v54, %v1393_v28 }
 0x16e   :  { %v3305_v50 = vpop.f32.mrb[61].mxu0  ;;  %v1626_v39 = vadd.f32 %v1625_v56, %v1624_v41  ;;  %v1618_v35 = vrot.slane %v1617_v59, 1  ;;  %v1255_v55 = vmax.f32 %v1063_v21, 0.0  ;;  %v794_v41 = vadd.f32 %v3251_v10, %v3106_v43 }
 0x16f   :  { %v3311_v5 = vpop.f32.mrb[62].mxu0  ;;  %v1630_v2 = vrot.slane %v1629_v45, 2  ;;  %v1806_v0 = vpack.c.bf16 %v1742_v17, %v1742_v17  ;;  %v1638_v20 = vadd.f32 %v1637_v32, %v1636_v29  ;;  %v1741_v51 = vmul.f32 0.0625, %v1395_v11 }
 0x170   :  { %v3313_v53 = vpop.f32.mrb[63].mxu0  ;;  %v1774_v19 = vmul.f32 0.0625, %v1626_v39  ;;  %v1619_v58 = vadd.f32 %v1618_v35, %v1617_v59  ;;  %v1188_v21 = vmax.f32 %v794_v41, 0.0  ;;  %v1253_v39 = vmax.f32 %v1055_v40, 0.0 }
 0x171   :  { %v1631_v9 = vadd.f32 %v1630_v2, %v1629_v45  ;;  %v1639_v56 = vrot.slane %v1638_v20, 1  ;;  %v1957_v28 = vunpack.c.l.b16 %v1806_v0  ;;  %v1805_v54 = vpack.c.bf16 %v1741_v51, %v1741_v51 }
 0x172   :  { %v1838_v22 = vpack.c.bf16 %v1774_v19, %v1774_v19  ;;  %v1773_v4 = vmul.f32 0.0625, %v1619_v58  ;;  %v1066_v45 = vadd.f32 %v3251_v10, %v3108_v1  ;;  %v1410_v32 = vadd.f32 %v1188_v21, %v1187_v31 }
 0x173   :  { %v1632_v44 = vrot.slane %v1631_v9, 1  ;;  %v1956_v35 = vunpack.c.l.b16 %v1805_v54  ;;  %v1640_v0 = vadd.f32 %v1639_v56, %v1638_v20  ;;  %v1058_v58 = vadd.f32 %v3251_v10, %v3115_v16 }
 0x174   :  { %v1989_v59 = vunpack.c.l.b16 %v1838_v22  ;;  %v1837_v29 = vpack.c.bf16 %v1773_v4, %v1773_v4  ;;  %v1256_v19 = vmax.f32 %v1066_v45, 0.0  ;;  %v1411_v41 = vrot.slane %v1410_v32, 4 }
 0x175   :  { %v3319_v17 = vpop.f32.mrb[64].mxu0  ;;  %v1633_v43 = vadd.f32 %v1632_v44, %v1631_v9  ;;  %v3334_v1 = vsel %vm2004_vm0, %v1957_v28, %v1956_v35  ;;  %v1186_v9 = vmax.f32 %v786_v15, 0.0  ;;  %v1254_v4 = vmax.f32 %v1058_v58, 0.0 }
 0x176   :  { %v3323_v12 = vpop.f32.mrb[65].mxu0  ;;  %v1988_v2 = vunpack.c.l.b16 %v1837_v29  ;;  %v1648_v22 = vadd.f32 %v1256_v19, %v1255_v55  ;;  %v1412_v56 = vadd.f32 %v1411_v41, %v1410_v32  ;;  %v807_v16 = vadd.f32 %v3251_v10, %v3129_v52 }
 0x177   :  { %v3327_v11 = vpop.f32.mrb[66].mxu0  ;;  %v1775_v40 = vmul.f32 0.0625, %v1633_v43  ;;  %v1403_v54 = vadd.f32 %v1186_v9, %v1185_v25  ;;  %v3341_v44 = vmul.f32 0.0625, %v1640_v0  ;;  %v1641_v21 = vadd.f32 %v1254_v4, %v1253_v39 }
 0x178   :  { %v3331_v51 = vpop.f32.mrb[67].mxu0  ;;  %v2053_v3 = vsel %vm2004_vm0, %v1989_v59, %v1988_v2  ;;  %v1649_v28 = vrot.slane %v1648_v22, 4  ;;  %v1079_v29 = vadd.f32 %v3251_v10, %v3131_v6  ;;  %v1413_v35 = vrot.slane %v1412_v56, 2 }
 0x179   :  { %v1839_v20 = vpack.c.bf16 %v1775_v40, %v1775_v40  ;;  %v1404_v43 = vrot.slane %v1403_v54, 4  ;;  %v1191_v15 = vmax.f32 %v807_v16, 0.0  ;;  %v1642_v55 = vrot.slane %v1641_v21, 4 }
 0x17a   :  { %v1650_v59 = vadd.f32 %v1649_v28, %v1648_v22  ;;  %v1259_v2 = vmax.f32 %v1079_v29, 0.0  ;;  %v799_v25 = vadd.f32 %v3251_v10, %v3135_v42  ;;  %v1414_v52 = vadd.f32 %v1413_v35, %v1412_v56  ;;  %v3658_v56 = vld [vmem:[#allocation15_spill] sm:$0xff] }
 0x17b   :  { %v1990_v45 = vunpack.c.l.b16 %v1839_v20  ;;  %v1405_v0 = vadd.f32 %v1404_v43, %v1403_v54  ;;  %v1071_v39 = vadd.f32 %v3251_v10, %v3137_v14  ;;  %v1643_v6 = vadd.f32 %v1642_v55, %v1641_v21  ;;  %v3659_v21 = vld [vmem:[#allocation16_spill] sm:$0xff] }
 0x17c   :  { %v1651_v19 = vrot.slane %v1650_v59, 2  ;;  %v1189_v58 = vmax.f32 %v799_v25, 0.0  ;;  %v810_v40 = vadd.f32 %v3251_v10, %v3141_v26  ;;  %v1415_v41 = vrot.slane %v1414_v52, 1 }
 0x17d   :  { %v3348_v32 = vsel %vm2006_vm1, %v1990_v45, %v2053_v3  ;;  %v1406_v9 = vrot.slane %v1405_v0, 2  ;;  %v1257_v22 = vmax.f32 %v1071_v39, 0.0  ;;  %v1082_v42 = vadd.f32 %v3251_v10, %v3143_v63 }
 0x17e   :  { %v1652_v4 = vadd.f32 %v1651_v19, %v1650_v59  ;;  %v1644_v3 = vrot.slane %v1643_v6, 2  ;;  %v1192_v20 = vmax.f32 %v810_v40, 0.0  ;;  %v802_v54 = vadd.f32 %v3251_v10, %v3658_v56 }
 0x17f   :  { %v1416_v16 = vadd.f32 %v1415_v41, %v1414_v52  ;;  %v1407_v14 = vadd.f32 %v1406_v9, %v1405_v0  ;;  %v1260_v28 = vmax.f32 %v1082_v42, 0.0  ;;  %v1074_v29 = vadd.f32 %v3251_v10, %v3659_v21 }
 0x180   :  { %v1653_v45 = vrot.slane %v1652_v4, 1  ;;  %v1645_v26 = vadd.f32 %v1644_v3, %v1643_v6  ;;  %v1424_v35 = vadd.f32 %v1192_v20, %v1191_v15  ;;  %v1190_v43 = vmax.f32 %v802_v54, 0.0 }
 0x181   :  { %v1744_v55 = vmul.f32 0.0625, %v1416_v16  ;;  %v1408_v25 = vrot.slane %v1407_v14, 1  ;;  %v1662_v39 = vadd.f32 %v1260_v28, %v1259_v2  ;;  %v1258_v63 = vmax.f32 %v1074_v29, 0.0 }
 0x182   :  { %v1654_v59 = vadd.f32 %v1653_v45, %v1652_v4  ;;  %v1646_v19 = vrot.slane %v1645_v26, 1  ;;  %v1425_v40 = vrot.slane %v1424_v35, 4  ;;  %v1417_v31 = vadd.f32 %v1190_v43, %v1189_v58 }
 0x183   :  { %v1840_v52 = vpack.c.bf16 %v3341_v44, %v3341_v44  ;;  %v1409_v0 = vadd.f32 %v1408_v25, %v1407_v14  ;;  %v1663_v41 = vrot.slane %v1662_v39, 4  ;;  %v1655_v9 = vadd.f32 %v1258_v63, %v1257_v22 }
 0x184   :  { %v1778_v42 = vmul.f32 0.0625, %v1654_v59  ;;  %v1647_v6 = vadd.f32 %v1646_v19, %v1645_v26  ;;  %v1426_v15 = vadd.f32 %v1425_v40, %v1424_v35  ;;  %v1418_v3 = vrot.slane %v1417_v31, 4 }
 0x185   :  { %v1808_v20 = vpack.c.bf16 %v1744_v55, %v1744_v55  ;;  %v1743_v56 = vmul.f32 0.0625, %v1409_v0  ;;  %v1664_v2 = vadd.f32 %v1663_v41, %v1662_v39  ;;  %v1656_v54 = vrot.slane %v1655_v9, 4  ;;  %v3661_v41 = vld [vmem:[#allocation10_spill] sm:$0xff] }
 0x186   :  { %v1842_v4 = vpack.c.bf16 %v1778_v42, %v1778_v42  ;;  %v1777_v16 = vmul.f32 0.0625, %v1647_v6  ;;  %v1427_v28 = vrot.slane %v1426_v15, 2  ;;  %v1419_v58 = vadd.f32 %v1418_v3, %v1417_v31 }
 0x187   :  { %v3660_v21 = vpack.c.bf16 %v3296_v36, %v3296_v36  ;;  %v1807_v14 = vpack.c.bf16 %v1743_v56, %v1743_v56  ;;  %v1665_v29 = vrot.slane %v1664_v2, 2  ;;  %v1657_v45 = vadd.f32 %v1656_v54, %v1655_v9  ;;  %v3663_v54 = vld [vmem:[#allocation5_spill] sm:$0xff] }
 0x188   :  { %v3365_v22 = vunpack.c.l.b16 %v1840_v52  ;;  %v1428_v26 = vadd.f32 %v1427_v28, %v1426_v15  ;;  %v1420_v35 = vrot.slane %v1419_v58, 2  ;;  %v823_v43 = vadd.f32 %v3251_v10, %v3162_v62  ;;  %v3664_v28 = vld [vmem:[#allocation9_spill] sm:$0xff] }
 0x189   :  { %v1954_v44 = vunpack.c.l.b16 %v3660_v21  ;;  %v1958_v55 = vunpack.c.l.b16 %v1807_v14  ;;  %v1841_v25 = vpack.c.bf16 %v1777_v16, %v1777_v16  ;;  %v1666_v39 = vadd.f32 %v1665_v29, %v1664_v2  ;;  %v3662_v2 = vld [vmem:[#allocation2_spill] sm:$0xff]  ;;  %v3665_v29 = vld [vmem:[#allocation8_spill] sm:$0xff] }
 0x18a   :  { %v1658_v63 = vrot.slane %v1657_v45, 2  ;;  %v1959_v59 = vunpack.c.l.b16 %v1808_v20  ;;  %v3369_v31 = vunpack.c.l.b16 %v1842_v4  ;;  %v1429_v19 = vrot.slane %v1428_v26, 1 }
 0x18b   :  { %v1421_v36 = vadd.f32 %v1420_v35, %v1419_v58  ;;  %v2026_v40 = vsel %vm2006_vm1, %v1958_v55, %v3334_v1  ;;  %v1667_v0 = vrot.slane %v1666_v39, 1  ;;  %v1796_v9 = vpack.c.bf16 %v3661_v41, %v3661_v41 }
 0x18c   :  { %v1659_v52 = vadd.f32 %v1658_v63, %v1657_v45  ;;  %v1430_v42 = vadd.f32 %v1429_v19, %v1428_v26  ;;  %v2027_v62 = vsel %vm2008_vm2, %v1959_v59, %v2026_v40  ;;  %v1195_v15 = vmax.f32 %v823_v43, 0.0  ;;  %v3666_v43 = vld [vmem:[#allocation13_spill] sm:$0xff] }
 0x18d   :  { %v1422_v6 = vrot.slane %v1421_v36, 1  ;;  %v3376_v3 = vunpack.c.l.b16 %v1841_v25  ;;  %v1668_v20 = vadd.f32 %v1667_v0, %v1666_v39  ;;  %v1804_v56 = vpack.c.bf16 %v3294_v49, %v3294_v49 }
 0x18e   :  { %v2009_v1 = vsel %vm2008_vm2, %v3663_v54, %v3662_v2  ;;  %v1746_v4 = vmul.f32 0.0625, %v1430_v42  ;;  %v1660_v21 = vrot.slane %v1659_v52, 1  ;;  %v1947_v14 = vunpack.c.l.b16 %v1796_v9  ;;  %v3667_v42 = vld [vmem:[#allocation20_spill] sm:$0xff] }
 0x18f   :  { %v1423_v16 = vadd.f32 %v1422_v6, %v1421_v36  ;;  %v2011_v58 = vsel %vm2010_vm3, %v3664_v28, %v2009_v1  ;;  %v1955_v55 = vunpack.c.l.b16 %v1804_v56  ;;  %v2020_v39 = vsel %vm2008_vm2, %v3216_v18, %v3198_v48 }
 0x190   :  { %v2013_v45 = vsel %vm2012_vm4, %v3665_v29, %v2011_v58  ;;  %v1810_v26 = vpack.c.bf16 %v1746_v4, %v1746_v4  ;;  %v815_v63 = vadd.f32 %v3251_v10, %v3166_v8  ;;  %v3395_v59 = vmul.f32 0.0625, %v1668_v20 }
 0x191   :  { %v1745_v35 = vmul.f32 0.0625, %v1423_v16  ;;  %v2015_v49 = vsel %vm2014_vm5, %v3666_v43, %v2013_v45  ;;  %v2021_v36 = vsel %vm2010_vm3, %v3290_v46, %v2020_v39  ;;  %v826_v40 = vadd.f32 %v3251_v10, %v3173_v13  ;;  %v3668_v13 = vld [vmem:[#allocation17_spill] sm:$0xff] }
 0x192   :  { %v2017_v25 = vsel %vm2016_vm6, %v1947_v14, %v2015_v49  ;;  %v1961_v0 = vunpack.c.l.b16 %v1810_v26  ;;  %v1661_v41 = vadd.f32 %v1660_v21, %v1659_v52  ;;  %v2022_v9 = vsel %vm2012_vm4, %v3240_v27, %v2021_v36  ;;  %v3669_v21 = vld [vmem:[#allocation18_spill] sm:$0xff]  ;;  %v3671_v43 = vld [vmem:[#allocation21_spill] sm:$0xff] }
 0x193   :  { %v1809_v19 = vpack.c.bf16 %v1745_v35, %v1745_v35  ;;  %v818_v48 = vadd.f32 %v3251_v10, %v3667_v42  ;;  %v2023_v8 = vsel %vm2014_vm5, %v1954_v44, %v2022_v9  ;;  %v1196_v6 = vmax.f32 %v826_v40, 0.0  ;;  %v3672_v42 = vld [vmem:[#allocation23_spill] sm:$0xff] }
 0x194   :  { %v839_v20 = vadd.f32 %v3251_v10, %v3186_v57  ;;  %v2024_v46 = vsel %vm2016_vm6, %v1955_v55, %v2023_v8  ;;  %v1193_v56 = vmax.f32 %v815_v63, 0.0  ;;  %v1095_v52 = vadd.f32 %v3251_v10, %v3668_v13 }
 0x195   :  { %v1960_v18 = vunpack.c.l.b16 %v1809_v19  ;;  %v1194_v2 = vmax.f32 %v818_v48, 0.0  ;;  %v2067_v27 = vpack.c.b16 %v2024_v46, %v2017_v25  ;;  %v1438_v1 = vadd.f32 %v1196_v6, %v1195_v15 }
 0x196   :  { %v1199_v4 = vmax.f32 %v839_v20, 0.0  ;;  %v1263_v44 = vmax.f32 %v1095_v52, 0.0  ;;  %v831_v57 = vadd.f32 %v3251_v10, %v3192_v23  ;;  %v1087_v14 = vadd.f32 %v3251_v10, %v3669_v21 }
 0x197   :  { %v2028_v54 = vsel %vm2010_vm3, %v1960_v18, %v2027_v62  ;;  %v1431_v16 = vadd.f32 %v1194_v2, %v1193_v56  ;;  %2526 = vmatprep.mubr.bf16.mxu1 %v2067_v27  ;;  %v1439_v58 = vrot.slane %v1438_v1, 4  ;;  %v842_v29 = vadd.f32 %v3251_v10, %v3204_v34  ;;  %v3670_v62 = vld [vmem:[#allocation19_spill] sm:$0xff]  ;;  %v3673_v27 = vld [vmem:[#allocation24_spill] sm:$0xff] }
 0x198   :  { %v3413_v28 = vsel %vm2012_vm4, %v1961_v0, %v2028_v54  ;;  %v1098_v15 = vadd.f32 %v3251_v10, %v3670_v62  ;;  %v1197_v26 = vmax.f32 %v831_v57, 0.0  ;;  %v834_v35 = vadd.f32 %v3251_v10, %v3208_v30 }
 0x199   :  { %v1432_v45 = vrot.slane %v1431_v16, 4  ;;  %v1090_v49 = vadd.f32 %v3251_v10, %v3671_v43  ;;  %v1440_v23 = vadd.f32 %v1439_v58, %v1438_v1  ;;  %v1261_v55 = vmax.f32 %v1087_v14, 0.0 }
 0x19a   :  { %v1200_v25 = vmax.f32 %v842_v29, 0.0  ;;  %v1264_v39 = vmax.f32 %v1098_v15, 0.0  ;;  %v1198_v19 = vmax.f32 %v834_v35, 0.0  ;;  %v1111_v34 = vadd.f32 %v3251_v10, %v3188_v7 }
 0x19b   :  { %v1433_v63 = vadd.f32 %v1432_v45, %v1431_v16  ;;  %v1262_v36 = vmax.f32 %v1090_v49, 0.0  ;;  %v1441_v40 = vrot.slane %v1440_v23, 2  ;;  %v1103_v48 = vadd.f32 %v3251_v10, %v3672_v42 }
 0x19c   :  { %v1452_v0 = vadd.f32 %v1200_v25, %v1199_v4  ;;  %v1676_v9 = vadd.f32 %v1264_v39, %v1263_v44  ;;  %v1445_v18 = vadd.f32 %v1198_v19, %v1197_v26  ;;  %v1267_v6 = vmax.f32 %v1111_v34, 0.0  ;;  %v3674_v44 = vld [vmem:[#allocation25_spill] sm:$0xff] }
 0x19d   :  { %v1434_v30 = vrot.slane %v1433_v63, 2  ;;  %v1669_v8 = vadd.f32 %v1262_v36, %v1261_v55  ;;  %v1442_v20 = vadd.f32 %v1441_v40, %v1440_v23  ;;  %v1265_v2 = vmax.f32 %v1103_v48, 0.0 }
 0x19e   :  { %v1453_v46 = vrot.slane %v1452_v0, 4  ;;  %v1677_v56 = vrot.slane %v1676_v9, 4  ;;  %v1446_v52 = vrot.slane %v1445_v18, 4  ;;  %v1114_v7 = vadd.f32 %v3251_v10, %v3673_v27 }
 0x19f   :  { %v1435_v13 = vadd.f32 %v1434_v30, %v1433_v63  ;;  %v1670_v54 = vrot.slane %v1669_v8, 4  ;;  %v1443_v1 = vrot.slane %v1442_v20, 1  ;;  %v1106_v57 = vadd.f32 %v3251_v10, %v3674_v44 }
 0x1a0   :  { %v1454_v4 = vadd.f32 %v1453_v46, %v1452_v0  ;;  %v1678_v16 = vadd.f32 %v1677_v56, %v1676_v9  ;;  %v1447_v21 = vadd.f32 %v1446_v52, %v1445_v18  ;;  %v1268_v29 = vmax.f32 %v1114_v7, 0.0 }
 0x1a1   :  { %v1436_v58 = vrot.slane %v1435_v13, 1  ;;  %v1671_v14 = vadd.f32 %v1670_v54, %v1669_v8  ;;  %v1779_v62 = vmul.f32 0.0625, %v1661_v41  ;;  %v1266_v26 = vmax.f32 %v1106_v57, 0.0 }
 0x1a2   :  { %v1455_v15 = vrot.slane %v1454_v4, 2  ;;  %v1679_v45 = vrot.slane %v1678_v16, 2  ;;  %v1448_v43 = vrot.slane %v1447_v21, 2  ;;  %v1690_v23 = vadd.f32 %v1268_v29, %v1267_v6 }
 0x1a3   :  { %v1437_v35 = vadd.f32 %v1436_v58, %v1435_v13  ;;  %v1672_v49 = vrot.slane %v1671_v14, 2  ;;  %v1444_v55 = vadd.f32 %v1443_v1, %v1442_v20  ;;  %v1683_v63 = vadd.f32 %v1266_v26, %v1265_v2 }
 0x1a4   :  { %v1456_v25 = vadd.f32 %v1455_v15, %v1454_v4  ;;  %v1680_v39 = vadd.f32 %v1679_v45, %v1678_v16  ;;  %v1449_v36 = vadd.f32 %v1448_v43, %v1447_v21  ;;  %v1691_v40 = vrot.slane %v1690_v23, 4 }
 0x1a5   :  { %v1747_v19 = vmul.f32 0.0625, %v1437_v35  ;;  %v1673_v34 = vadd.f32 %v1672_v49, %v1671_v14  ;;  %v1843_v0 = vpack.c.bf16 %v1779_v62, %v1779_v62  ;;  %v1684_v48 = vrot.slane %v1683_v63, 4 }
 0x1a6   :  { %v1457_v9 = vrot.slane %v1456_v25, 1  ;;  %v1681_v42 = vrot.slane %v1680_v39, 1  ;;  %v1450_v30 = vrot.slane %v1449_v36, 1  ;;  %v1692_v8 = vadd.f32 %v1691_v40, %v1690_v23 }
 0x1a7   :  { %v1811_v41 = vpack.c.bf16 %v1747_v19, %v1747_v19  ;;  %v1674_v18 = vrot.slane %v1673_v34, 1  ;;  %v3435_v46 = vmul.f32 0.0625, %v1444_v55  ;;  %v1685_v20 = vadd.f32 %v1684_v48, %v1683_v63 }
 0x1a8   :  { %v1458_v56 = vadd.f32 %v1457_v9, %v1456_v25  ;;  %v1682_v6 = vadd.f32 %v1681_v42, %v1680_v39  ;;  %v1451_v52 = vadd.f32 %v1450_v30, %v1449_v36  ;;  %v1693_v54 = vrot.slane %v1692_v8, 2  ;;  %v3676_v30 = vld [vmem:[#allocation30_spill] sm:$0xff] }
 0x1a9   :  { %v1962_v13 = vunpack.c.l.b16 %v1811_v41  ;;  %v1675_v2 = vadd.f32 %v1674_v18, %v1673_v34  ;;  %v1686_v1 = vrot.slane %v1685_v20, 2  ;;  %v855_v4 = vadd.f32 %v3251_v10, %v3226_v38 }
 0x1aa   :  { %v1750_v27 = vmul.f32 0.0625, %v1458_v56  ;;  %v1782_v7 = vmul.f32 0.0625, %v1682_v6  ;;  %v1749_v44 = vmul.f32 0.0625, %v1451_v52  ;;  %v1694_v58 = vadd.f32 %v1693_v54, %v1692_v8  ;;  %v3677_v56 = vld [vmem:[#allocation31_spill] sm:$0xff]  ;;  %v3678_v6 = vld [vmem:[#allocation32_spill] sm:$0xff]  ;;  %v3679_v54 = vld [vmem:[#allocation33_spill] sm:$0xff] }
 0x1ab   :  { %v3441_v16 = vsel %vm2014_vm5, %v1962_v13, %v3413_v28  ;;  %v1781_v57 = vmul.f32 0.0625, %v1675_v2  ;;  %v3443_v21 = vunpack.c.l.b16 %v1843_v0  ;;  %v1687_v62 = vadd.f32 %v1686_v1, %v1685_v20  ;;  %v3675_v0 = vld [vmem:[#allocation29_spill] sm:$0xff] }
 0x1ac   :  { %v1814_v14 = vpack.c.bf16 %v1750_v27, %v1750_v27  ;;  %v1846_v29 = vpack.c.bf16 %v1782_v7, %v1782_v7  ;;  %v1813_v15 = vpack.c.bf16 %v1749_v44, %v1749_v44  ;;  %v1695_v26 = vrot.slane %v1694_v58, 1 }
 0x1ad   :  { %v1845_v45 = vpack.c.bf16 %v1781_v57, %v1781_v57  ;;  %v1127_v35 = vadd.f32 %v3251_v10, %v3228_v60  ;;  %v1688_v49 = vrot.slane %v1687_v62, 1  ;;  %v847_v28 = vadd.f32 %v3251_v10, %v3236_v33 }
 0x1ae   :  { %v1965_v43 = vunpack.c.l.b16 %v1814_v14  ;;  %v1997_v38 = vunpack.c.l.b16 %v1846_v29  ;;  %v1812_v23 = vpack.c.bf16 %v3435_v46, %v3435_v46  ;;  %v1964_v55 = vunpack.c.l.b16 %v1813_v15 }
 0x1af   :  { %v1996_v25 = vunpack.c.l.b16 %v1845_v45  ;;  %v1203_v39 = vmax.f32 %v855_v4, 0.0  ;;  %v1696_v63 = vadd.f32 %v1695_v26, %v1694_v58  ;;  %v1689_v19 = vadd.f32 %v1688_v49, %v1687_v62  ;;  %v3680_v45 = vld [vmem:[#allocation34_spill] sm:$0xff] }
 0x1b0   :  { %v1119_v36 = vadd.f32 %v3251_v10, %v3238_v47  ;;  %v858_v60 = vadd.f32 %v3251_v10, %v3242_v61  ;;  %v3456_v34 = vsel %vm2004_vm0, %v1965_v43, %v1964_v55  ;;  %v1271_v33 = vmax.f32 %v1127_v35, 0.0  ;;  %v3681_v35 = vld [vmem:[#allocation35_spill] sm:$0xff]  ;;  %v3682_v55 = vld [vmem:[#allocation36_spill] sm:$0xff] }
 0x1b1   :  { %v2060_v40 = vsel %vm2004_vm0, %v1997_v38, %v1996_v25  ;;  %v1130_v9 = vadd.f32 %v3251_v10, %v3675_v0  ;;  %v1783_v42 = vmul.f32 0.0625, %v1689_v19  ;;  %v1201_v48 = vmax.f32 %v847_v28, 0.0 }
 0x1b2   :  { %v1204_v41 = vmax.f32 %v858_v60, 0.0  ;;  %v850_v18 = vadd.f32 %v3251_v10, %v3676_v30  ;;  %v1269_v8 = vmax.f32 %v1119_v36, 0.0  ;;  %v1122_v61 = vadd.f32 %v3251_v10, %v3677_v56  ;;  %v3684_v30 = vld [vmem:[#allocation38_spill] sm:$0xff] }
 0x1b3   :  { %v1272_v47 = vmax.f32 %v1130_v9, 0.0  ;;  %v871_v20 = vadd.f32 %v3251_v10, %v3678_v6  ;;  %v1847_v13 = vpack.c.bf16 %v1783_v42, %v1783_v42  ;;  %v1143_v27 = vadd.f32 %v3251_v10, %v3679_v54  ;;  %v3683_v9 = vld [vmem:[#allocation37_spill] sm:$0xff] }
 0x1b4   :  { %v1466_v52 = vadd.f32 %v1204_v41, %v1203_v39  ;;  %v1202_v2 = vmax.f32 %v850_v18, 0.0  ;;  %v3469_v7 = vmul.f32 0.0625, %v1696_v63  ;;  %v1270_v4 = vmax.f32 %v1122_v61, 0.0  ;;  %v3685_v18 = vld [vmem:[#allocation39_spill] sm:$0xff] }
 0x1b5   :  { %v1704_v1 = vadd.f32 %v1272_v47, %v1271_v33  ;;  %v1207_v44 = vmax.f32 %v871_v20, 0.0  ;;  %v1998_v57 = vunpack.c.l.b16 %v1847_v13  ;;  %v1275_v29 = vmax.f32 %v1143_v27, 0.0 }
 0x1b6   :  { %v1467_v58 = vrot.slane %v1466_v52, 4  ;;  %v1459_v14 = vadd.f32 %v1202_v2, %v1201_v48  ;;  %v1697_v15 = vadd.f32 %v1270_v4, %v1269_v8  ;;  %v863_v26 = vadd.f32 %v3251_v10, %v3680_v45 }
 0x1b7   :  { %v1705_v62 = vrot.slane %v1704_v1, 4  ;;  %v1135_v43 = vadd.f32 %v3251_v10, %v3681_v35  ;;  %v3476_v38 = vsel %vm2006_vm1, %v1998_v57, %v2060_v40  ;;  %v874_v25 = vadd.f32 %v3251_v10, %v3682_v55 }
 0x1b8   :  { %v1468_v49 = vadd.f32 %v1467_v58, %v1466_v52  ;;  %v1460_v28 = vrot.slane %v1459_v14, 4  ;;  %v1698_v63 = vrot.slane %v1697_v15, 4  ;;  %v1205_v19 = vmax.f32 %v863_v26, 0.0 }
 0x1b9   :  { %v1706_v39 = vadd.f32 %v1705_v62, %v1704_v1  ;;  %v1273_v36 = vmax.f32 %v1135_v43, 0.0  ;;  %v1208_v0 = vmax.f32 %v874_v25, 0.0  ;;  %v1146_v42 = vadd.f32 %v3251_v10, %v3683_v9 }
 0x1ba   :  { %v1469_v60 = vrot.slane %v1468_v49, 2  ;;  %v1461_v33 = vadd.f32 %v1460_v28, %v1459_v14  ;;  %v1699_v41 = vadd.f32 %v1698_v63, %v1697_v15  ;;  %v866_v40 = vadd.f32 %v3251_v10, %v3684_v30 }
 0x1bb   :  { %v1707_v48 = vrot.slane %v1706_v39, 2  ;;  %v1138_v8 = vadd.f32 %v3251_v10, %v3685_v18  ;;  %v1480_v61 = vadd.f32 %v1208_v0, %v1207_v44  ;;  %v1276_v6 = vmax.f32 %v1146_v42, 0.0 }
 0x1bc   :  { %v1470_v47 = vadd.f32 %v1469_v60, %v1468_v49  ;;  %v1462_v56 = vrot.slane %v1461_v33, 2  ;;  %v1700_v13 = vrot.slane %v1699_v41, 2  ;;  %v1206_v52 = vmax.f32 %v866_v40, 0.0 }
 0x1bd   :  { %v1708_v20 = vadd.f32 %v1707_v48, %v1706_v39  ;;  %v1274_v2 = vmax.f32 %v1138_v8, 0.0  ;;  %v1481_v1 = vrot.slane %v1480_v61, 4  ;;  %v1718_v4 = vadd.f32 %v1276_v6, %v1275_v29 }
 0x1be   :  { %v1471_v54 = vrot.slane %v1470_v47, 1  ;;  %v1463_v27 = vadd.f32 %v1462_v56, %v1461_v33  ;;  %v1701_v58 = vadd.f32 %v1700_v13, %v1699_v41  ;;  %v1473_v14 = vadd.f32 %v1206_v52, %v1205_v19 }
 0x1bf   :  { %v1709_v57 = vrot.slane %v1708_v20, 1  ;;  %v1711_v62 = vadd.f32 %v1274_v2, %v1273_v36  ;;  %v1482_v26 = vadd.f32 %v1481_v1, %v1480_v61  ;;  %v1719_v35 = vrot.slane %v1718_v4, 4 }
 0x1c0   :  { %v1472_v15 = vadd.f32 %v1471_v54, %v1470_v47  ;;  %v1464_v45 = vrot.slane %v1463_v27, 1  ;;  %v1702_v49 = vrot.slane %v1701_v58, 1  ;;  %v1474_v44 = vrot.slane %v1473_v14, 4 }
 0x1c1   :  { %v1710_v43 = vadd.f32 %v1709_v57, %v1708_v20  ;;  %v1712_v28 = vrot.slane %v1711_v62, 4  ;;  %v1483_v39 = vrot.slane %v1482_v26, 2  ;;  %v1720_v63 = vadd.f32 %v1719_v35, %v1718_v4 }
 0x1c2   :  { %v1752_v55 = vmul.f32 0.0625, %v1472_v15  ;;  %v1465_v25 = vadd.f32 %v1464_v45, %v1463_v27  ;;  %v1703_v33 = vadd.f32 %v1702_v49, %v1701_v58  ;;  %v1475_v0 = vadd.f32 %v1474_v44, %v1473_v14 }
 0x1c3   :  { %v1786_v60 = vmul.f32 0.0625, %v1710_v43  ;;  %v1713_v29 = vadd.f32 %v1712_v28, %v1711_v62  ;;  %v1848_v19 = vpack.c.bf16 %v3469_v7, %v3469_v7  ;;  %v1484_v9 = vadd.f32 %v1483_v39, %v1482_v26 }
 0x1c4   :  { %v1751_v36 = vmul.f32 0.0625, %v1465_v25  ;;  %v1721_v42 = vrot.slane %v1720_v63, 2  ;;  %v1816_v48 = vpack.c.bf16 %v1752_v55, %v1752_v55  ;;  %v1785_v41 = vmul.f32 0.0625, %v1703_v33 }
 0x1c5   :  { %v1476_v30 = vrot.slane %v1475_v0, 2  ;;  %v1714_v40 = vrot.slane %v1713_v29, 2  ;;  %v1850_v18 = vpack.c.bf16 %v1786_v60, %v1786_v60  ;;  %v1485_v47 = vrot.slane %v1484_v9, 1 }
 0x1c6   :  { %v1815_v8 = vpack.c.bf16 %v1751_v36, %v1751_v36  ;;  %v1722_v56 = vadd.f32 %v1721_v42, %v1720_v63  ;;  %v1963_v61 = vunpack.c.l.b16 %v1812_v23  ;;  %v1849_v6 = vpack.c.bf16 %v1785_v41, %v1785_v41 }
 0x1c7   :  { %v1477_v20 = vadd.f32 %v1476_v30, %v1475_v0  ;;  %v1715_v13 = vadd.f32 %v1714_v40, %v1713_v29  ;;  %v1486_v7 = vadd.f32 %v1485_v47, %v1484_v9  ;;  %v887_v54 = vadd.f32 %v3251_v10, %v3300_v37 }
 0x1c8   :  { %v1966_v52 = vunpack.c.l.b16 %v1815_v8  ;;  %v1723_v2 = vrot.slane %v1722_v56, 1  ;;  %v3493_v27 = vunpack.c.l.b16 %v1848_v19  ;;  %v1967_v1 = vunpack.c.l.b16 %v1816_v48  ;;  %v3686_v8 = vld [vmem:[#allocation28_spill] sm:$0xff] }
 0x1c9   :  { %v1478_v4 = vrot.slane %v1477_v20, 1  ;;  %v1716_v57 = vrot.slane %v1715_v13, 1  ;;  %v3495_v58 = vunpack.c.l.b16 %v1850_v18  ;;  %v1754_v23 = vmul.f32 0.0625, %v1486_v7  ;;  %v3689_v7 = vld [vmem:[#allocation27_spill] sm:$0xff] }
 0x1ca   :  { %v2033_v46 = vsel %vm2006_vm1, %v1966_v52, %v3456_v34  ;;  %v879_v14 = vadd.f32 %v3251_v10, %v3305_v50  ;;  %v1724_v62 = vadd.f32 %v1723_v2, %v1722_v56  ;;  %v3502_v37 = vunpack.c.l.b16 %v1849_v6  ;;  %v3687_v56 = vld [vmem:[#allocation14_spill] sm:$0xff] }
 0x1cb   :  { %v1479_v15 = vadd.f32 %v1478_v4, %v1477_v20  ;;  %v2034_v45 = vsel %vm2008_vm2, %v1967_v1, %v2033_v46  ;;  %v1717_v26 = vadd.f32 %v1716_v57, %v1715_v13  ;;  %v1211_v35 = vmax.f32 %v887_v54, 0.0  ;;  %v3688_v6 = vld [vmem:[#allocation22_spill] sm:$0xff] }
 0x1cc   :  { %v890_v43 = vadd.f32 %v3251_v10, %v3311_v5  ;;  %v882_v49 = vadd.f32 %v3251_v10, %v3313_v53  ;;  %v1818_v44 = vpack.c.bf16 %v1754_v23, %v1754_v23  ;;  %v903_v50 = vadd.f32 %v3251_v10, %v3319_v17  ;;  %v3690_v46 = vld [vmem:[#allocation26_spill] sm:$0xff] }
 0x1cd   :  { %v1753_v34 = vmul.f32 0.0625, %v1479_v15  ;;  %v1787_v28 = vmul.f32 0.0625, %v1717_v26  ;;  %v1209_v55 = vmax.f32 %v879_v14, 0.0  ;;  %v906_v63 = vadd.f32 %v3251_v10, %v3327_v11 }
 0x1ce   :  { %v1212_v25 = vmax.f32 %v890_v43, 0.0  ;;  %v1210_v39 = vmax.f32 %v882_v49, 0.0  ;;  %v1788_v60 = vmul.f32 0.0625, %v1724_v62  ;;  %v1215_v0 = vmax.f32 %v903_v50, 0.0 }
 0x1cf   :  { %v1817_v33 = vpack.c.bf16 %v1753_v34, %v1753_v34  ;;  %v895_v5 = vadd.f32 %v3251_v10, %v3323_v12  ;;  %v1216_v19 = vmax.f32 %v906_v63, 0.0  ;;  %v898_v36 = vadd.f32 %v3251_v10, %v3331_v51 }
 0x1d0   :  { %v1494_v29 = vadd.f32 %v1212_v25, %v1211_v35  ;;  %v1487_v53 = vadd.f32 %v1210_v39, %v1209_v55  ;;  %v1969_v9 = vunpack.c.l.b16 %v1818_v44  ;;  %v1851_v42 = vpack.c.bf16 %v1787_v28, %v1787_v28 }
 0x1d1   :  { %v1968_v17 = vunpack.c.l.b16 %v1817_v33  ;;  %v3518_v48 = vsel %vm2016_vm6, %v1963_v61, %v3441_v16  ;;  %v1508_v30 = vadd.f32 %v1216_v19, %v1215_v0  ;;  %v1214_v40 = vmax.f32 %v898_v36, 0.0 }
 0x1d2   :  { %v1495_v11 = vrot.slane %v1494_v29, 4  ;;  %v1488_v41 = vrot.slane %v1487_v53, 4  ;;  %v1213_v12 = vmax.f32 %v895_v5, 0.0  ;;  %v1836_v47 = vpack.c.bf16 %v3686_v8, %v3686_v8 }
 0x1d3   :  { %v2035_v18 = vsel %vm2010_vm3, %v1968_v17, %v2034_v45  ;;  %v2048_v10 = vsel %vm2008_vm2, %v3688_v6, %v3687_v56  ;;  %v1509_v16 = vrot.slane %v1508_v30, 4  ;;  %v1844_v54 = vpack.c.bf16 %v3395_v59, %v3395_v59  ;;  %v3696_v6 = vld [vmem:[#allocation7_spill] sm:$0xff] }
 0x1d4   :  { %v1496_v51 = vadd.f32 %v1495_v11, %v1494_v29  ;;  %v1489_v20 = vadd.f32 %v1488_v41, %v1487_v53  ;;  %v2036_v13 = vsel %vm2012_vm4, %v1969_v9, %v2035_v18  ;;  %v1501_v61 = vadd.f32 %v1214_v40, %v1213_v12  ;;  %v3694_v11 = vld [vmem:[#allocation12_spill] sm:$0xff] }
 0x1d5   :  { %v1987_v52 = vunpack.c.l.b16 %v1836_v47  ;;  %v2049_v2 = vsel %vm2010_vm3, %v3689_v7, %v2048_v10  ;;  %v1510_v57 = vadd.f32 %v1509_v16, %v1508_v30  ;;  %v2002_v14 = vunpack.c.l.b16 %v1851_v42  ;;  %v3697_v7 = vld [vmem:[#allocation4_spill] sm:$0xff] }
 0x1d6   :  { %v1497_v1 = vrot.slane %v1496_v51, 2  ;;  %v1490_v4 = vrot.slane %v1489_v20, 2  ;;  %v2050_v23 = vsel %vm2012_vm4, %v3690_v46, %v2049_v2  ;;  %v1502_v62 = vrot.slane %v1501_v61, 4 }
 0x1d7   :  { %v2051_v15 = vsel %vm2014_vm5, %v3292_v24, %v2050_v23  ;;  %v1852_v45 = vpack.c.bf16 %v1788_v60, %v1788_v60  ;;  %v1511_v43 = vrot.slane %v1510_v57, 2  ;;  %v1995_v59 = vunpack.c.l.b16 %v1844_v54  ;;  %v3698_v54 = vld [vmem:[#allocation6_spill] sm:$0xff] }
 0x1d8   :  { %v1498_v26 = vadd.f32 %v1497_v1, %v1496_v51  ;;  %v1491_v35 = vadd.f32 %v1490_v4, %v1489_v20  ;;  %v3536_v49 = vsel %vm2016_vm6, %v1987_v52, %v2051_v15  ;;  %v1503_v44 = vadd.f32 %v1502_v62, %v1501_v61 }
 0x1d9   :  { %v2055_v34 = vsel %vm2008_vm2, %v3365_v22, %v3348_v32  ;;  %v2062_v28 = vsel %vm2008_vm2, %v3493_v27, %v3476_v38  ;;  %v1512_v24 = vadd.f32 %v1511_v43, %v1510_v57  ;;  %v2003_v63 = vunpack.c.l.b16 %v1852_v45  ;;  %v3691_v27 = vld [vmem:[#allocation11_spill] sm:$0xff] }
 0x1da   :  { %v1499_v50 = vrot.slane %v1498_v26, 1  ;;  %v1492_v55 = vrot.slane %v1491_v35, 1  ;;  %v2056_v25 = vsel %vm2010_vm3, %v3376_v3, %v2055_v34  ;;  %v1504_v39 = vrot.slane %v1503_v44, 2 }
 0x1db   :  { %v2057_v60 = vsel %vm2012_vm4, %v3369_v31, %v2056_v25  ;;  %v2063_v33 = vsel %vm2010_vm3, %v3502_v37, %v2062_v28  ;;  %v1513_v22 = vrot.slane %v1512_v24, 1  ;;  %v1555_v5 = vrot.slane %v3691_v27, 1  ;;  %v3692_v37 = vld [vmem:[#allocation3_spill] sm:$0xff] }
 0x1dc   :  { %v1500_v0 = vadd.f32 %v1499_v50, %v1498_v26  ;;  %v1493_v32 = vadd.f32 %v1492_v55, %v1491_v35  ;;  %v2058_v38 = vsel %vm2014_vm5, %v3443_v21, %v2057_v60  ;;  %v1505_v29 = vadd.f32 %v1504_v39, %v1503_v44 }
 0x1dd   :  { %v2059_v53 = vsel %vm2016_vm6, %v1995_v59, %v2058_v38  ;;  %v2064_v3 = vsel %vm2012_vm4, %v3495_v58, %v2063_v33  ;;  %v1514_v31 = vadd.f32 %v1513_v22, %v1512_v24  ;;  %v3693_v17 = vrot.slane %v3692_v37, 1 }
 0x1de   :  { %v1756_v19 = vmul.f32 0.0625, %v1500_v0  ;;  %v1755_v36 = vmul.f32 0.0625, %v1493_v32  ;;  %v2065_v9 = vsel %vm2014_vm5, %v2002_v14, %v2064_v3  ;;  %v3695_v21 = vrot.slane %v3694_v11, 1  ;;  %v2273_v32 = vld [vmem:[%s3612_s4] ss:$0 sm:$0xff] }
 0x1df   :  { %v1542_v42 = vadd.f32 %v3693_v17, %v3692_v37  ;;  %v1506_v30 = vrot.slane %v1505_v29, 1  ;;  %v2066_v40 = vsel %vm2016_vm6, %v2003_v63, %v2065_v9  ;;  %v1758_v8 = vmul.f32 0.0625, %v1514_v31 }
 0x1e0   :  { %v1549_v41 = vadd.f32 %v3695_v21, %v3694_v11  ;;  %v1820_v18 = vpack.c.bf16 %v1756_v19, %v1756_v19  ;;  %v1819_v12 = vpack.c.bf16 %v1755_v36, %v1755_v36  ;;  %v2070_v58 = vpack.c.b16 %v2066_v40, %v2059_v53 }
 0x1e1   :  { %v1556_v47 = vadd.f32 %v1555_v5, %v3691_v27  ;;  %v1507_v56 = vadd.f32 %v1506_v30, %v1505_v29  ;;  %v1761_v10 = vmul.f32 0.0625, %v3696_v6  ;;  %v1822_v20 = vpack.c.bf16 %v1758_v8, %v1758_v8 }
 0x1e2   :  { %v1970_v51 = vunpack.c.l.b16 %v1819_v12  ;;  %v1762_v16 = vmul.f32 0.0625, %v1542_v42  ;;  %v1971_v61 = vunpack.c.l.b16 %v1820_v18  ;;  %v1824_v2 = vpack.c.bf16 %v3697_v7, %v3697_v7 }
 0x1e3   :  { %v1757_v52 = vmul.f32 0.0625, %v1507_v56  ;;  %v1823_v1 = vpack.c.bf16 %v3698_v54, %v3698_v54  ;;  %v1763_v4 = vmul.f32 0.0625, %v1549_v41  ;;  %v1764_v46 = vmul.f32 0.0625, %v1556_v47 }
 0x1e4   :  { %v2037_v57 = vsel %vm2014_vm5, %v1970_v51, %v2036_v13  ;;  %v1973_v23 = vunpack.c.l.b16 %v1822_v20  ;;  %v1825_v15 = vpack.c.bf16 %v1761_v10, %v1761_v10  ;;  %v1826_v26 = vpack.c.bf16 %v1762_v16, %v1762_v16 }
 0x1e5   :  { %v1821_v14 = vpack.c.bf16 %v1757_v52, %v1757_v52  ;;  %v2038_v62 = vsel %vm2016_vm6, %v1971_v61, %v2037_v57  ;;  %v1974_v43 = vunpack.c.l.b16 %v1823_v1  ;;  %v1827_v44 = vpack.c.bf16 %v1763_v4, %v1763_v4 }
 0x1e6   :  { %v2068_v45 = vpack.c.b16 %v2038_v62, %v3518_v48  ;;  %v1975_v59 = vunpack.c.l.b16 %v1824_v2  ;;  %v1828_v28 = vpack.c.bf16 %v1764_v46, %v1764_v46  ;;  %v1976_v50 = vunpack.c.l.b16 %v1825_v15 }
 0x1e7   :  { %v1972_v35 = vunpack.c.l.b16 %v1821_v14  ;;  %v1977_v55 = vunpack.c.l.b16 %v1826_v26  ;;  %v1978_v25 = vunpack.c.l.b16 %v1827_v44 }
 0x1e8   :  { %2527 = vmatmul.mubr.bf16.vlgmr.msra.gmra.mrb[60].mxu1 %v2068_v45  ;;  %v1979_v63 = vunpack.c.l.b16 %v1828_v28 }
 0x1e9   :  { %v2039_v34 = vsel %vm2004_vm0, %v1973_v23, %v1972_v35 }
 0x1ea   :  { %v2040_v13 = vsel %vm2006_vm1, %v1974_v43, %v2039_v34 }
 0x1eb   :  { %v2041_v24 = vsel %vm2008_vm2, %v1975_v59, %v2040_v13 }
 0x1ec   :  { %v2042_v39 = vsel %vm2010_vm3, %v1976_v50, %v2041_v24 }
 0x1ed   :  { %v2043_v48 = vsel %vm2012_vm4, %v1977_v55, %v2042_v39 }
 0x1ee   :  { %v2044_v60 = vsel %vm2014_vm5, %v1978_v25, %v2043_v48 }
 0x1ef   :  { %v2045_v33 = vsel %vm2016_vm6, %v1979_v63, %v2044_v60 }
 0x1f0   :  { %v2069_v0 = vpack.c.b16 %v3536_v49, %v2045_v33 }
 0x1f2   :  { %2530 = vmatprep.mubr.bf16.mxu1 %v2069_v0 }
 0x1f3   :  { %2531 = vmatmul.mubr.bf16.gmra.mrb[64].mxu1 %v2070_v58 }
 0x2bb   :  { %v2528_v22 = vpop.f32.mrb[60].mxu1 }
 0x2bc   :  { %v2166_v38 = vadd.f32 %v2528_v22, %v2273_v32  ;;  %v2157_v27 = vpop.f32.mrb[61].mxu1 }
 0x2bd   :  { %v2158_v5 = vadd.f32 %v2273_v32, %v2157_v27  ;;  %v2529_v29 = vpop.f32.mrb[62].mxu1 }
 0x2be   :  { %2190 = vst [vmem:[%s3613_s5 + $0x10] sm:$0xff] %v2166_v38  ;;  %v2169_v53 = vadd.f32 %v2529_v29, %v2273_v32  ;;  %v2160_v3 = vpop.f32.mrb[63].mxu1 }
 0x2bf   :  { %2188 = vst [vmem:[%s3613_s5] sm:$0xff] %v2158_v5  ;;  %v2161_v49 = vadd.f32 %v2273_v32, %v2160_v3 }
 0x2c0   :  { %2191 = vst [vmem:[%s3613_s5 + $0x18] sm:$0xff] %v2169_v53 }
 0x2c1   :  { %2189 = vst [vmem:[%s3613_s5 + $0x8] sm:$0xff] %v2161_v49 }
 0x2c6   :  { %v2532_v19 = vpop.f32.mrb[64].mxu1 }
 0x2c7   :  { %v2182_v36 = vadd.f32 %v2532_v19, %v2273_v32  ;;  %v2173_v31 = vpop.f32.mrb[65].mxu1 }
 0x2c8   :  { %v2174_v9 = vadd.f32 %v2273_v32, %v2173_v31  ;;  %v2533_v37 = vpop.f32.mrb[66].mxu1 }
 0x2c9   :  { %2194 = vst [vmem:[%s3613_s5 + $0x30] sm:$0xff] %v2182_v36  ;;  %v2185_v17 = vadd.f32 %v2533_v37, %v2273_v32  ;;  %v2176_v42 = vpop.f32.mrb[67].mxu1 }
 0x2ca   :  { %2192 = vst [vmem:[%s3613_s5 + $0x20] sm:$0xff] %v2174_v9  ;;  %v2177_v11 = vadd.f32 %v2273_v32, %v2176_v42 }
 0x2cb   :  { %2195 = vst [vmem:[%s3613_s5 + $0x38] sm:$0xff] %v2185_v17 }
 0x2cc   :  { %2193 = vst [vmem:[%s3613_s5 + $0x28] sm:$0xff] %v2177_v11 }

// kernel: forward.3
= control target key start
LH: loop header
LB: loop body
LE: loop exit
PB: predicated region body
PF: predicated region fallthrough
CT: control target
= control target key end

     0   :  { %s1233_s1 = inlined_call_operand.vmem [shape: bf16[256,256], index: 1, kind: input, shape index: {}]   ;;  %s1234_s0 = inlined_call_operand.vmem [shape: bf16[8,256], index: 0, kind: input, shape index: {}]   ;;  %s1235_s3 = inlined_call_operand.vmem [shape: bf16[256,256], index: 3, kind: input, shape index: {}]   ;;  %s1236_s5 = inlined_call_operand.vmem [shape: bf16[256,128], index: 5, kind: input, shape index: {}]   ;;  %s1237_s2 = inlined_call_operand.vmem [shape: f32[1,256], index: 2, kind: input, shape index: {}]   ;;  %s1238_s4 = inlined_call_operand.vmem [shape: f32[1,256], index: 4, kind: input, shape index: {}]   ;;  %s1239_s6 = inlined_call_operand.vmem [shape: f32[1,128], index: 6, kind: input, shape index: {}]   ;;  %s1240_s7 = inlined_call_operand.vmem [shape: f32[8,128], index: 7, kind: output, shape index: {}]  }
   0x1   :  { %v818_v0 = vld [vmem:[%s1233_s1 + $0x4] ss:$8 sps:$4 sm:$0xff]   ;;  %v820_v1 = vld [vmem:[%s1233_s1] ss:$8 sps:$4 sm:$0xff]   ;;  %v821_v2 = vld [vmem:[%s1233_s1 + $0x14] ss:$8 sps:$4 sm:$0xff]  }
   0x2   :  { %239 = vmatprep.subr.bf16.mxu0 %v818_v0  ;;  %v823_v3 = vld [vmem:[%s1233_s1 + $0x10] ss:$8 sps:$4 sm:$0xff]   ;;  %v824_v4 = vld [vmem:[%s1233_s1 + $0x24] ss:$8 sps:$4 sm:$0xff]   ;;  %v826_v5 = vld [vmem:[%s1233_s1 + $0x20] ss:$8 sps:$4 sm:$0xff]  }
   0x3   :  { %240 = vmatpush1.bf16.msra.mxu0 %v820_v1  ;;  %v827_v6 = vld [vmem:[%s1233_s1 + $0x34] ss:$8 sps:$4 sm:$0xff]   ;;  %v829_v7 = vld [vmem:[%s1233_s1 + $0x30] ss:$8 sps:$4 sm:$0xff]   ;;  %v830_v8 = vld [vmem:[%s1233_s1 + $0x44] ss:$8 sps:$4 sm:$0xff]  }
   0x4   :  { %241 = vmatprep.subr.bf16.mxu0 %v821_v2  ;;  %v832_v9 = vld [vmem:[%s1233_s1 + $0x40] ss:$8 sps:$4 sm:$0xff]   ;;  %v833_v10 = vld [vmem:[%s1233_s1 + $0x54] ss:$8 sps:$4 sm:$0xff]   ;;  %v835_v11 = vld [vmem:[%s1233_s1 + $0x50] ss:$8 sps:$4 sm:$0xff]  }
   0x5   :  { %v836_v12 = vld [vmem:[%s1233_s1 + $0x64] ss:$8 sps:$4 sm:$0xff]   ;;  %v838_v13 = vld [vmem:[%s1233_s1 + $0x60] ss:$8 sps:$4 sm:$0xff]   ;;  %v871_v18 = vld [vmem:[%s1235_s3 + $0x14] ss:$8 sps:$4 sm:$0xff]  }
   0x6   :  { %v1017_v14 = vld [vmem:[%s1234_s0] sm:$0xff]  ;;  %v839_v19 = vld [vmem:[%s1233_s1 + $0x74] ss:$8 sps:$4 sm:$0xff]   ;;  %v841_v20 = vld [vmem:[%s1233_s1 + $0x70] ss:$8 sps:$4 sm:$0xff]  }
   0x7   :  { %242 = vmatpush1.bf16.msra.mxu0 %v823_v3  ;;  %v714_v15 = vcombine.high %v1017_v14, %v1017_v14  ;;  %v868_v16 = vld [vmem:[%s1235_s3 + $0x4] ss:$8 sps:$4 sm:$0xff]   ;;  %v870_v17 = vld [vmem:[%s1235_s3] ss:$8 sps:$4 sm:$0xff]   ;;  %v873_v21 = vld [vmem:[%s1235_s3 + $0x10] ss:$8 sps:$4 sm:$0xff]   ;;  %v713_v55 = vcombine.low %v1017_v14, %v1017_v14 }
   0x8   :  { %243 = vmatprep.subr.bf16.mxu0 %v824_v4  ;;  %488 = vmatprep.subr.bf16.mxu1 %v868_v16  ;;  %v874_v22 = vld [vmem:[%s1235_s3 + $0x24] ss:$8 sps:$4 sm:$0xff]   ;;  %v844_v24 = vld [vmem:[%s1233_s1 + $0x80] ss:$8 sps:$4 sm:$0xff]   ;;  %v877_v26 = vld [vmem:[%s1235_s3 + $0x34] ss:$8 sps:$4 sm:$0xff]  }
   0x9   :  { %271 = vmatprep.mubr.bf16.mxu0 %v714_v15  ;;  %489 = vmatpush1.bf16.msra.mxu1 %v870_v17  ;;  %v842_v23 = vld [vmem:[%s1233_s1 + $0x84] ss:$8 sps:$4 sm:$0xff]   ;;  %v876_v25 = vld [vmem:[%s1235_s3 + $0x20] ss:$8 sps:$4 sm:$0xff]   ;;  %v845_v27 = vld [vmem:[%s1233_s1 + $0x94] ss:$8 sps:$4 sm:$0xff]   ;;  %v62_v15 = vlaneseq }
   0xa   :  { %490 = vmatprep.subr.bf16.mxu1 %v871_v18  ;;  %v847_v28 = vld [vmem:[%s1233_s1 + $0x90] ss:$8 sps:$4 sm:$0xff]   ;;  %v880_v30 = vld [vmem:[%s1235_s3 + $0x44] ss:$8 sps:$4 sm:$0xff]   ;;  %v850_v32 = vld [vmem:[%s1233_s1 + $0xa0] ss:$8 sps:$4 sm:$0xff]  }
   0xb   :  { %244 = vmatpush1.bf16.msra.mxu0 %v826_v5  ;;  %v879_v29 = vld [vmem:[%s1235_s3 + $0x30] ss:$8 sps:$4 sm:$0xff]   ;;  %v848_v31 = vld [vmem:[%s1233_s1 + $0xa4] ss:$8 sps:$4 sm:$0xff]   ;;  %v882_v33 = vld [vmem:[%s1235_s3 + $0x40] ss:$8 sps:$4 sm:$0xff]  }
   0xc   :  { %245 = vmatprep.subr.bf16.mxu0 %v827_v6  ;;  %v883_v34 = vld [vmem:[%s1235_s3 + $0x54] ss:$8 sps:$4 sm:$0xff]   ;;  %v885_v36 = vld [vmem:[%s1235_s3 + $0x50] ss:$8 sps:$4 sm:$0xff]   ;;  %v886_v38 = vld [vmem:[%s1235_s3 + $0x64] ss:$8 sps:$4 sm:$0xff]  }
   0xd   :  { %491 = vmatpush1.bf16.msra.mxu1 %v873_v21  ;;  %v851_v35 = vld [vmem:[%s1233_s1 + $0xb4] ss:$8 sps:$4 sm:$0xff]   ;;  %v853_v37 = vld [vmem:[%s1233_s1 + $0xb0] ss:$8 sps:$4 sm:$0xff]   ;;  %v854_v39 = vld [vmem:[%s1233_s1 + $0xc4] ss:$8 sps:$4 sm:$0xff]  }
   0xe   :  { %492 = vmatprep.subr.bf16.mxu1 %v874_v22  ;;  %v888_v40 = vld [vmem:[%s1235_s3 + $0x60] ss:$8 sps:$4 sm:$0xff]   ;;  %v889_v42 = vld [vmem:[%s1235_s3 + $0x74] ss:$8 sps:$4 sm:$0xff]   ;;  %v891_v44 = vld [vmem:[%s1235_s3 + $0x70] ss:$8 sps:$4 sm:$0xff]  }
   0xf   :  { %246 = vmatpush1.bf16.msra.mxu0 %v829_v7  ;;  %v856_v41 = vld [vmem:[%s1233_s1 + $0xc0] ss:$8 sps:$4 sm:$0xff]   ;;  %v857_v43 = vld [vmem:[%s1233_s1 + $0xd4] ss:$8 sps:$4 sm:$0xff]   ;;  %v859_v45 = vld [vmem:[%s1233_s1 + $0xd0] ss:$8 sps:$4 sm:$0xff]  }
  0x10   :  { %247 = vmatprep.subr.bf16.mxu0 %v830_v8  ;;  %v892_v46 = vld [vmem:[%s1235_s3 + $0x84] ss:$8 sps:$4 sm:$0xff]   ;;  %v894_v48 = vld [vmem:[%s1235_s3 + $0x80] ss:$8 sps:$4 sm:$0xff]   ;;  %v895_v50 = vld [vmem:[%s1235_s3 + $0x94] ss:$8 sps:$4 sm:$0xff]  }
  0x11   :  { %493 = vmatpush1.bf16.msra.mxu1 %v876_v25  ;;  %v860_v47 = vld [vmem:[%s1233_s1 + $0xe4] ss:$8 sps:$4 sm:$0xff]   ;;  %v862_v49 = vld [vmem:[%s1233_s1 + $0xe0] ss:$8 sps:$4 sm:$0xff]   ;;  %v863_v51 = vld [vmem:[%s1233_s1 + $0xf4] ss:$8 sps:$4 sm:$0xff]  }
  0x12   :  { %494 = vmatprep.subr.bf16.mxu1 %v877_v26  ;;  %v897_v52 = vld [vmem:[%s1235_s3 + $0x90] ss:$8 sps:$4 sm:$0xff]   ;;  %v898_v54 = vld [vmem:[%s1235_s3 + $0xa4] ss:$8 sps:$4 sm:$0xff]   ;;  %v900_v56 = vld [vmem:[%s1235_s3 + $0xa0] ss:$8 sps:$4 sm:$0xff]  }
  0x13   :  { %248 = vmatpush1.bf16.msra.mxu0 %v832_v9  ;;  %v865_v53 = vld [vmem:[%s1233_s1 + $0xf0] ss:$8 sps:$4 sm:$0xff]   ;;  %v901_v57 = vld [vmem:[%s1235_s3 + $0xb4] ss:$8 sps:$4 sm:$0xff]   ;;  %v904_v59 = vld [vmem:[%s1235_s3 + $0xc4] ss:$8 sps:$4 sm:$0xff]  }
  0x14   :  { %249 = vmatprep.subr.bf16.mxu0 %v833_v10  ;;  %v903_v58 = vld [vmem:[%s1235_s3 + $0xb0] ss:$8 sps:$4 sm:$0xff]   ;;  %v906_v60 = vld [vmem:[%s1235_s3 + $0xc0] ss:$8 sps:$4 sm:$0xff]   ;;  %v907_v61 = vld [vmem:[%s1235_s3 + $0xd4] ss:$8 sps:$4 sm:$0xff]  }
  0x15   :  { %495 = vmatpush1.bf16.msra.mxu1 %v879_v29  ;;  %v909_v62 = vld [vmem:[%s1235_s3 + $0xd0] ss:$8 sps:$4 sm:$0xff]   ;;  %v910_v63 = vld [vmem:[%s1235_s3 + $0xe4] ss:$8 sps:$4 sm:$0xff]   ;;  %v912_v0 = vld [vmem:[%s1235_s3 + $0xe0] ss:$8 sps:$4 sm:$0xff]  }
  0x16   :  { %496 = vmatprep.subr.bf16.mxu1 %v880_v30  ;;  %v913_v1 = vld [vmem:[%s1235_s3 + $0xf4] ss:$8 sps:$4 sm:$0xff]   ;;  %v915_v2 = vld [vmem:[%s1235_s3 + $0xf0] ss:$8 sps:$4 sm:$0xff]   ;;  %v916_v3 = vld [vmem:[%s1236_s5 + $0x40] sm:$0xff]   ;;  %v63_v16 = vshrl.u32 %v62_v15, 7 }
  0x17   :  { %250 = vmatpush1.bf16.msra.mxu0 %v835_v11  ;;  %v917_v4 = vld [vmem:[%s1236_s5] sm:$0xff]   ;;  %v918_v5 = vld [vmem:[%s1236_s5 + $0x48] sm:$0xff]   ;;  %v920_v7 = vld [vmem:[%s1236_s5 + $0x50] sm:$0xff]  }
  0x18   :  { %251 = vmatprep.subr.bf16.mxu0 %v836_v12  ;;  %v919_v6 = vld [vmem:[%s1236_s5 + $0x8] sm:$0xff]   ;;  %v921_v8 = vld [vmem:[%s1236_s5 + $0x10] sm:$0xff]   ;;  %v922_v9 = vld [vmem:[%s1236_s5 + $0x58] sm:$0xff]   ;;  %v64_v17 = vsub.s32 0, %v63_v16 }
  0x19   :  { %497 = vmatpush1.bf16.msra.mxu1 %v882_v33  ;;  %v923_v10 = vld [vmem:[%s1236_s5 + $0x18] sm:$0xff]   ;;  %v924_v11 = vld [vmem:[%s1236_s5 + $0x60] sm:$0xff]   ;;  %v927_v14 = vld [vmem:[%s1236_s5 + $0x28] sm:$0xff]  }
  0x1a   :  { %498 = vmatprep.subr.bf16.mxu1 %v883_v34  ;;  %v925_v12 = vld [vmem:[%s1236_s5 + $0x20] sm:$0xff]   ;;  %v929_v33 = vld [vmem:[%s1236_s5 + $0x30] sm:$0xff]   ;;  %v930_v34 = vld [vmem:[%s1236_s5 + $0x78] sm:$0xff]  }
  0x1b   :  { %252 = vmatpush1.bf16.msra.mxu0 %v838_v13  ;;  %v926_v13 = vld [vmem:[%s1236_s5 + $0x68] sm:$0xff]   ;;  %v60_v18 = vld [vmem:[%s1237_s2] sm:$0x3] }
  0x1c   :  { %253 = vmatprep.subr.bf16.mxu0 %v839_v19  ;;  %v68_v19 = vsub.s32 1, %v63_v16 }
  0x1d   :  { %499 = vmatpush1.bf16.msra.mxu1 %v885_v36  ;;  %v316_v36 = vld [vmem:[%s1238_s4] sm:$0x3] }
  0x1e   :  { %500 = vmatprep.subr.bf16.mxu1 %v886_v38  ;;  %v69_v21 = vrot.slane %v60_v18, %v68_v19  ;;  %v325_v38 = vrot.slane %v316_v36, %v68_v19 }
  0x1f   :  { %254 = vmatpush1.bf16.msra.mxu0 %v841_v20  ;;  %v65_v20 = vrot.slane %v60_v18, %v64_v17 }
  0x20   :  { %255 = vmatprep.subr.bf16.mxu0 %v842_v23 }
  0x21   :  { %501 = vmatpush1.bf16.msra.mxu1 %v888_v40 }
  0x22   :  { %502 = vmatprep.subr.bf16.mxu1 %v889_v42 }
  0x23   :  { %256 = vmatpush1.bf16.msra.mxu0 %v844_v24 }
  0x24   :  { %257 = vmatprep.subr.bf16.mxu0 %v845_v27 }
  0x25   :  { %503 = vmatpush1.bf16.msra.mxu1 %v891_v44 }
  0x26   :  { %504 = vmatprep.subr.bf16.mxu1 %v892_v46 }
  0x27   :  { %258 = vmatpush1.bf16.msra.mxu0 %v847_v28 }
  0x28   :  { %259 = vmatprep.subr.bf16.mxu0 %v848_v31 }
  0x29   :  { %505 = vmatpush1.bf16.msra.mxu1 %v894_v48 }
  0x2a   :  { %506 = vmatprep.subr.bf16.mxu1 %v895_v50  ;;  %v779_v50 = vld [vmem:[%s1239_s6] ss:$0 sm:$0xff] }
  0x2b   :  { %260 = vmatpush1.bf16.msra.mxu0 %v850_v32  ;;  %v928_v32 = vld [vmem:[%s1236_s5 + $0x70] sm:$0xff]  }
  0x2c   :  { %261 = vmatprep.subr.bf16.mxu0 %v851_v35  ;;  %v931_v35 = vld [vmem:[%s1236_s5 + $0x38] sm:$0xff]  }
  0x2d   :  { %507 = vmatpush1.bf16.msra.mxu1 %v897_v52 }
  0x2e   :  { %508 = vmatprep.subr.bf16.mxu1 %v898_v54 }
  0x2f   :  { %262 = vmatpush1.bf16.msra.mxu0 %v853_v37  ;;  %v321_v37 = vrot.slane %v316_v36, %v64_v17 }
  0x30   :  { %263 = vmatprep.subr.bf16.mxu0 %v854_v39 }
  0x31   :  { %509 = vmatpush1.bf16.msra.mxu1 %v900_v56 }
  0x32   :  { %510 = vmatprep.subr.bf16.mxu1 %v901_v57 }
  0x33   :  { %264 = vmatpush1.bf16.msra.mxu0 %v856_v41 }
  0x34   :  { %265 = vmatprep.subr.bf16.mxu0 %v857_v43 }
  0x35   :  { %511 = vmatpush1.bf16.msra.mxu1 %v903_v58 }
  0x36   :  { %512 = vmatprep.subr.bf16.mxu1 %v904_v59 }
  0x37   :  { %266 = vmatpush1.bf16.msra.mxu0 %v859_v45 }
  0x38   :  { %267 = vmatprep.subr.bf16.mxu0 %v860_v47 }
  0x39   :  { %513 = vmatpush1.bf16.msra.mxu1 %v906_v60 }
  0x3a   :  { %514 = vmatprep.subr.bf16.mxu1 %v907_v61 }
  0x3b   :  { %268 = vmatpush1.bf16.msra.mxu0 %v862_v49 }
  0x3c   :  { %269 = vmatprep.subr.bf16.mxu0 %v863_v51 }
  0x3d   :  { %515 = vmatpush1.bf16.msra.mxu1 %v909_v62 }
  0x3e   :  { %516 = vmatprep.subr.bf16.mxu1 %v910_v63 }
  0x3f   :  { %270 = vmatpush1.bf16.msra.mxu0 %v865_v53 }
  0x40   :  { %796 = vmatprep.subr.bf16.mxu0 %v916_v3 }
  0x41   :  { %517 = vmatpush1.bf16.msra.mxu1 %v912_v0 }
  0x42   :  { %272 = vmatmul.mubr.bf16.vlgmr.msra.gmra.mrb[0].mxu0 %v713_v55  ;;  %518 = vmatprep.subr.bf16.mxu1 %v913_v1 }
  0x43   :  { %797 = vmatpush3.bf16.msra.mxu0 %v917_v4 }
  0x44   :  { %798 = vmatprep.subr.bf16.mxu0 %v918_v5 }
  0x45   :  { %519 = vmatpush1.bf16.msra.mxu1 %v915_v2 }
  0x47   :  { %799 = vmatpush3.bf16.msra.mxu0 %v919_v6 }
  0x48   :  { %800 = vmatprep.subr.bf16.mxu0 %v920_v7 }
  0x4b   :  { %801 = vmatpush3.bf16.msra.mxu0 %v921_v8 }
  0x4c   :  { %802 = vmatprep.subr.bf16.mxu0 %v922_v9 }
  0x4f   :  { %803 = vmatpush3.bf16.msra.mxu0 %v923_v10 }
  0x50   :  { %804 = vmatprep.subr.bf16.mxu0 %v924_v11 }
  0x53   :  { %805 = vmatpush3.bf16.msra.mxu0 %v925_v12 }
  0x54   :  { %806 = vmatprep.subr.bf16.mxu0 %v926_v13 }
  0x57   :  { %807 = vmatpush3.bf16.msra.mxu0 %v927_v14 }
  0x58   :  { %808 = vmatprep.subr.bf16.mxu0 %v928_v32 }
  0x5b   :  { %809 = vmatpush3.bf16.msra.mxu0 %v929_v33 }
  0x5c   :  { %810 = vmatprep.subr.bf16.mxu0 %v930_v34 }
  0x5f   :  { %811 = vmatpush3.bf16.msra.mxu0 %v931_v35 }
 0x115   :  { %v273_v22 = vpop.f32.mrb[0].mxu0 }
 0x116   :  { %v274_v23 = vadd.f32 %v273_v22, %v65_v20  ;;  %v275_v24 = vpop.f32.mrb[1].mxu0 }
 0x117   :  { %v276_v25 = vadd.f32 %v275_v24, %v69_v21  ;;  %v277_v26 = vpop.f32.mrb[2].mxu0 }
 0x118   :  { %v280_v27 = vmax.f32 %v274_v23, 0.0  ;;  %v278_v28 = vpop.f32.mrb[3].mxu0 }
 0x119   :  { %v281_v29 = vmax.f32 %v276_v25, 0.0 }
 0x11a   :  { %v282_v31 = vpack.c.bf16 %v280_v27, %v280_v27 }
 0x11b   :  { %v283_v30 = vpack.c.bf16 %v281_v29, %v281_v29 }
 0x11d   :  { %520 = vmatprep.mubr.bf16.mxu1 %v283_v30 }
 0x11e   :  { %521 = vmatmul.mubr.bf16.vlgmr.msra.gmra.mrb[0].mxu1 %v282_v31 }
 0x1f1   :  { %v522_v39 = vpop.f32.mrb[0].mxu1 }
 0x1f2   :  { %v523_v40 = vadd.f32 %v522_v39, %v321_v37  ;;  %v524_v41 = vpop.f32.mrb[1].mxu1 }
 0x1f3   :  { %v525_v42 = vadd.f32 %v524_v41, %v325_v38  ;;  %v526_v43 = vpop.f32.mrb[2].mxu1 }
 0x1f4   :  { %v529_v44 = vmax.f32 %v523_v40, 0.0  ;;  %v527_v45 = vpop.f32.mrb[3].mxu1 }
 0x1f5   :  { %v530_v46 = vmax.f32 %v525_v42, 0.0 }
 0x1f6   :  { %v531_v48 = vpack.c.bf16 %v529_v44, %v529_v44 }
 0x1f7   :  { %v532_v47 = vpack.c.bf16 %v530_v46, %v530_v46 }
 0x1f9   :  { %700 = vmatprep.mubr.bf16.mxu0 %v532_v47 }
 0x1fa   :  { %701 = vmatmul.mubr.bf16.vlgmr.msra.gmra.mrb[4].mxu0 %v531_v48 }
 0x2cd   :  { %v812_v49 = vpop.f32.mrb[4].mxu0 }
 0x2ce   :  { %v813_v51 = vpop.f32.mrb[5].mxu0 }
 0x2cf   :  { %v814_v52 = vadd.f32 %v813_v51, %v812_v49  ;;  %v815_v53 = vpop.f32.mrb[6].mxu0 }
 0x2d0   :  { %v816_v54 = vpop.f32.mrb[7].mxu0 }
 0x2d1   :  { %v703_v55 = vadd.f32 %v814_v52, %v779_v50 }
 0x2d3   :  { %708 = vst [vmem:[%s1240_s7] sm:$0xff] %v703_v55 }

</bundles_post_ra>
